<compile_context>
chip_gen: v7x
topology: tpu7x:2x2x1
jax: 0.10.0
libtpu: 0.0.40
codegen_flags: <defaults>
</compile_context>

<pallas_src>
import functools

import jax
import jax.numpy as jnp
from jax.experimental import pallas as pl
from jax.experimental.pallas import tpu as pltpu


def _sdpa_kernel(q_ref, k_ref, v_ref, x_ref, attn_ref, *, inv_temperature):
    # Refs are (G, L, D) / (G, L, L): G heads handled per grid step.
    q = q_ref[...]
    k = k_ref[...]
    v = v_ref[...]

    # scores: (G, L, L). Contraction on D with g as batch dim -> no k transpose.
    # HIGHEST precision keeps full f32 accuracy for f32 inputs (bf16 inputs are
    # already MXU-native).  Scale folded in after the matmul as one f32 mul.
    s = jnp.einsum(
        "gld,gmd->glm",
        q,
        k,
        preferred_element_type=jnp.float32,
        precision=jax.lax.Precision.HIGHEST,
    ) * inv_temperature

    # Numerically-stable softmax over the last axis, in f32 on the VPU/EUP
    # (v5e has no bf16 VPU/EUP path, so f32 here is right on all generations).
    m = jnp.max(s, axis=-1, keepdims=True)
    e = jnp.exp(s - m)
    denom = jnp.sum(e, axis=-1, keepdims=True)
    # Exact division: EUP/VPU are nowhere near saturated at these sizes and
    # this keeps attn rows summing to 1, matching the PyTorch reference.
    p = e / denom

    # Single cast to the output dtype; reused for the attn store and as the
    # LHS of the second matmul (matches PyTorch, where attn is already in the
    # input dtype when it multiplies v).
    p_lo = p.astype(attn_ref.dtype)
    attn_ref[...] = p_lo

    x = jnp.einsum(
        "glm,gmd->gld",
        p_lo,
        v,
        preferred_element_type=jnp.float32,
        precision=jax.lax.Precision.HIGHEST,
    )
    x_ref[...] = x.astype(x_ref.dtype)


def scale_dot_product_attention_spatial(q, k, v, temperature):
    """q, k, v: (B, H, L, D) arrays. Returns (x, attn) like the PyTorch module.

    attn is returned in q.dtype (as in PyTorch); softmax math is done in f32.
    """
    B, H, L, D = q.shape
    BH = B * H

    # Grid-step selection: one step holding all heads unless per-block work is
    # large enough to amortize an extra ~0.35 us grid step (then split 2-way so
    # v7x megacore can shard the steps across its two TensorCores; on v5e/v6e
    # the grid is a serial loop so the single-step path is always taken for
    # small problems).
    total_flops = 4 * BH * L * L * D  # two matmuls, 2 flops per MAC
    split_threshold_flops = 64 * 1024 * 1024
    num_blocks = 2 if (BH % 2 == 0 and total_flops >= split_threshold_flops) else 1
    G = BH // num_blocks

    qf = q.reshape(BH, L, D)
    kf = k.reshape(BH, L, D)
    vf = v.reshape(BH, L, D)

    kernel = functools.partial(
        _sdpa_kernel, inv_temperature=1.0 / float(temperature)
    )

    itemsize = jnp.dtype(q.dtype).itemsize
    cost = pl.CostEstimate(
        flops=total_flops,
        transcendentals=BH * L * L,  # exp
        bytes_accessed=(4 * BH * L * D + BH * L * L) * itemsize,
    )

    x_flat, attn_flat = pl.pallas_call(
        kernel,
        out_shape=(
            jax.ShapeDtypeStruct((BH, L, D), q.dtype),
            jax.ShapeDtypeStruct((BH, L, L), q.dtype),
        ),
        grid_spec=pltpu.PrefetchScalarGridSpec(
            num_scalar_prefetch=0,
            grid=(num_blocks,),
            in_specs=[
                pl.BlockSpec((G, L, D), lambda i: (i, 0, 0)),
                pl.BlockSpec((G, L, D), lambda i: (i, 0, 0)),
                pl.BlockSpec((G, L, D), lambda i: (i, 0, 0)),
            ],
            out_specs=[
                pl.BlockSpec((G, L, D), lambda i: (i, 0, 0)),
                pl.BlockSpec((G, L, L), lambda i: (i, 0, 0)),
            ],
        ),
        compiler_params=pltpu.CompilerParams(
            dimension_semantics=("parallel",)
        ),
        cost_estimate=cost,
    )(qf, kf, vf)

    return x_flat.reshape(B, H, L, D), attn_flat.reshape(B, H, L, L)


def _reference(q, k, v, temperature):
    # Same precision as the kernel so the comparison isolates kernel errors,
    # not XLA's default-precision (bf16-truncated) f32 matmuls.
    s = jnp.einsum(
        "bhld,bhmd->bhlm", q / temperature, k,
        precision=jax.lax.Precision.HIGHEST,
    )
    p = jax.nn.softmax(s, axis=-1)
    x = jnp.einsum(
        "bhlm,bhmd->bhld", p, v,
        precision=jax.lax.Precision.HIGHEST,
    )
    return x, p


if __name__ == "__main__":
    # Small shapes consistent with the module's forward: (B, H, L, D)
    B, H, L, D = 2, 4, 16, 32
    temperature = float(D) ** 0.5

    key = jax.random.PRNGKey(0)
    kq, kk, kv = jax.random.split(key, 3)
    q = jax.random.normal(kq, (B, H, L, D), dtype=jnp.float32)
    k = jax.random.normal(kk, (B, H, L, D), dtype=jnp.float32)
    v = jax.random.normal(kv, (B, H, L, D), dtype=jnp.float32)

    x, attn = scale_dot_product_attention_spatial(q, k, v, temperature)
    x = jax.block_until_ready(x)
    attn = jax.block_until_ready(attn)

    x_ref, attn_ref = _reference(q, k, v, temperature)
    assert x.shape == (B, H, L, D) and attn.shape == (B, H, L, L)
    assert jnp.allclose(x, x_ref, atol=2e-3, rtol=2e-3), "x mismatch"
    assert jnp.allclose(attn, attn_ref, atol=2e-3, rtol=2e-3), "attn mismatch"

    print("KERNEL_OK")
</pallas_src>

<mosaic_0001>
module attributes {stable_mosaic.version = 11 : i64} {
  func.func @_sdpa_kernel(%arg0: i32, %arg1: memref<8x16x32xf32, #tpu.memory_space<vmem>>, %arg2: memref<8x16x32xf32, #tpu.memory_space<vmem>>, %arg3: memref<8x16x32xf32, #tpu.memory_space<vmem>>, %arg4: memref<8x16x32xf32, #tpu.memory_space<vmem>>, %arg5: memref<8x16x16xf32, #tpu.memory_space<vmem>>) attributes {dimension_semantics = [#tpu.dimension_semantics<parallel>], iteration_bounds = array<i64: 1>, scalar_prefetch = 0 : i64, scratch_operands = 0 : i64, tpu.core_type = #tpu.core_type<tc>, window_params = [{transform_indices = @transform_0, window_bounds = array<i64: 8, 16, 32>}, {transform_indices = @transform_1, window_bounds = array<i64: 8, 16, 32>}, {transform_indices = @transform_2, window_bounds = array<i64: 8, 16, 32>}, {transform_indices = @transform_3, window_bounds = array<i64: 8, 16, 32>}, {transform_indices = @transform_4, window_bounds = array<i64: 8, 16, 16>}]} {
    %c0 = arith.constant 0 : index
    %c0_0 = arith.constant 0 : index
    %c0_1 = arith.constant 0 : index
    %0 = vector.load %arg1[%c0, %c0_0, %c0_1] : memref<8x16x32xf32, #tpu.memory_space<vmem>>, vector<8x16x32xf32>
    %c0_2 = arith.constant 0 : index
    %c0_3 = arith.constant 0 : index
    %c0_4 = arith.constant 0 : index
    %1 = vector.load %arg2[%c0_2, %c0_3, %c0_4] : memref<8x16x32xf32, #tpu.memory_space<vmem>>, vector<8x16x32xf32>
    %c0_5 = arith.constant 0 : index
    %c0_6 = arith.constant 0 : index
    %c0_7 = arith.constant 0 : index
    %2 = vector.load %arg3[%c0_5, %c0_6, %c0_7] : memref<8x16x32xf32, #tpu.memory_space<vmem>>, vector<8x16x32xf32>
    "tpu.trace_start"() <{level = 10 : i32, message = "gld,gmd->glm"}> : () -> ()
    %cst = arith.constant dense<0.000000e+00> : vector<8x16x16xf32>
    %3 = tpu.matmul %0, %1, %cst {dimension_numbers = #tpu.dot_dimension_numbers<[2], [2], [1], [1], [0, 0, 0, 1, 1, 1], [0], [0]>, precision = #tpu.contract_precision<fp32>} : vector<8x16x32xf32>, vector<8x16x32xf32>, vector<8x16x16xf32> -> vector<8x16x16xf32>
    "tpu.trace_stop"() : () -> ()
    %cst_8 = arith.constant 0.176776692 : f32
    %4 = vector.broadcast %cst_8 : f32 to vector<8x16x16xf32>
    %5 = arith.mulf %3, %4 : vector<8x16x16xf32>
    %cst_9 = arith.constant dense<0xFF800000> : vector<8x16xf32>
    %6 = vector.multi_reduction <maximumf>, %5, %cst_9 [2] : vector<8x16x16xf32> to vector<8x16xf32>
    %7 = vector.shape_cast %6 : vector<8x16xf32> to vector<8x16x1xf32>
    %8 = vector.broadcast %7 : vector<8x16x1xf32> to vector<8x16x16xf32>
    %9 = arith.subf %5, %8 : vector<8x16x16xf32>
    %10 = math.exp %9 : vector<8x16x16xf32>
    %cst_10 = arith.constant dense<0.000000e+00> : vector<8x16xf32>
    %11 = vector.multi_reduction <add>, %10, %cst_10 [2] : vector<8x16x16xf32> to vector<8x16xf32>
    %12 = vector.shape_cast %11 : vector<8x16xf32> to vector<8x16x1xf32>
    %13 = vector.broadcast %12 : vector<8x16x1xf32> to vector<8x16x16xf32>
    %14 = arith.divf %10, %13 : vector<8x16x16xf32>
    %c0_11 = arith.constant 0 : index
    %c0_12 = arith.constant 0 : index
    %c0_13 = arith.constant 0 : index
    %15 = vector.load %arg5[%c0_11, %c0_12, %c0_13] : memref<8x16x16xf32, #tpu.memory_space<vmem>>, vector<8x16x16xf32>
    tpu.vector_store %arg5[%c0_11, %c0_12, %c0_13], %14 {strides = array<i32>} : memref<8x16x16xf32, #tpu.memory_space<vmem>>, vector<8x16x16xf32>,
    "tpu.trace_start"() <{level = 10 : i32, message = "glm,gmd->gld"}> : () -> ()
    %cst_14 = arith.constant dense<0.000000e+00> : vector<8x16x32xf32>
    %16 = tpu.matmul %14, %2, %cst_14 {dimension_numbers = #tpu.dot_dimension_numbers<[2], [1], [1], [2], [0, 0, 0, 1, 1, 2], [0], [0]>, precision = #tpu.contract_precision<fp32>} : vector<8x16x16xf32>, vector<8x16x32xf32>, vector<8x16x32xf32> -> vector<8x16x32xf32>
    "tpu.trace_stop"() : () -> ()
    %c0_15 = arith.constant 0 : index
    %c0_16 = arith.constant 0 : index
    %c0_17 = arith.constant 0 : index
    %17 = vector.load %arg4[%c0_15, %c0_16, %c0_17] : memref<8x16x32xf32, #tpu.memory_space<vmem>>, vector<8x16x32xf32>
    tpu.vector_store %arg4[%c0_15, %c0_16, %c0_17], %16 {strides = array<i32>} : memref<8x16x32xf32, #tpu.memory_space<vmem>>, vector<8x16x32xf32>,
    return
  }
  func.func @transform_0(%arg0: i32) -> (i32, i32, i32) {
    %c0_i32 = arith.constant 0 : i32
    %c0_i32_0 = arith.constant 0 : i32
    %c0_i32_1 = arith.constant 0 : i32
    return %arg0, %c0_i32, %c0_i32_0 : i32, i32, i32
  }
  func.func @transform_1(%arg0: i32) -> (i32, i32, i32) {
    %c0_i32 = arith.constant 0 : i32
    %c0_i32_0 = arith.constant 0 : i32
    %c0_i32_1 = arith.constant 0 : i32
    return %arg0, %c0_i32, %c0_i32_0 : i32, i32, i32
  }
  func.func @transform_2(%arg0: i32) -> (i32, i32, i32) {
    %c0_i32 = arith.constant 0 : i32
    %c0_i32_0 = arith.constant 0 : i32
    %c0_i32_1 = arith.constant 0 : i32
    return %arg0, %c0_i32, %c0_i32_0 : i32, i32, i32
  }
  func.func @transform_3(%arg0: i32) -> (i32, i32, i32) {
    %c0_i32 = arith.constant 0 : i32
    %c0_i32_0 = arith.constant 0 : i32
    %c0_i32_1 = arith.constant 0 : i32
    return %arg0, %c0_i32, %c0_i32_0 : i32, i32, i32
  }
  func.func @transform_4(%arg0: i32) -> (i32, i32, i32) {
    %c0_i32 = arith.constant 0 : i32
    %c0_i32_0 = arith.constant 0 : i32
    %c0_i32_1 = arith.constant 0 : i32
    return %arg0, %c0_i32, %c0_i32_0 : i32, i32, i32
  }
}

</mosaic_0001>

<bundles_post_ra>
// kernel: tpu_custom_call.1
= control target key start
LH: loop header
LB: loop body
LE: loop exit
PB: predicated region body
PF: predicated region fallthrough
CT: control target
= control target key end

     0   :  { %10 = vsyncpa [#allocation3], 0  ;;  %s11364_s0 = inlined_call_operand.hbm [shape: f32[8,16,32], index: 0, kind: input, shape index: {}]   ;;  %s11365_s1 = inlined_call_operand.hbm [shape: f32[8,16,32], index: 1, kind: input, shape index: {}]   ;;  %s11366_s2 = inlined_call_operand.hbm [shape: f32[8,16,32], index: 2, kind: input, shape index: {}]   ;;  %s11367_s3 = inlined_call_operand.hbm [shape: f32[8,16,32], index: 3, kind: output, shape index: {0}]   ;;  %s11368_s4 = inlined_call_operand.hbm [shape: f32[8,16,16], index: 4, kind: output, shape index: {1}]  }
   0x1   :  { %11 = vsyncpa [#allocation6], 0 }
   0x2   :  { %12 = vsyncpa [#allocation4], 0 }
   0x3   :  { %13 = vsyncpa [#allocation10], 0  ;;  %s10332_s15 = smov [#allocation5]   ;;  %s10333_s17 = smov [#allocation2]  }
   0x4   :  { %s31_s16 = sshll.u32 %s10332_s15, 4  ;;  %s19_s18 = sshll.u32 %s10333_s17, 4  ;;  %s32_s16 = int_to_ptr.vmem [resolvable:$true] %s31_s16  ;;  %s10364_s18 = int_to_ptr.vmem [resolvable:$true] %s19_s18 }
   0x5   :  { %s10214_s21 = scalar_lea.hbm %s11365_s1, 2048 }
   0x6   :  { %p10215_p0 = scmp.ne.s32.totalorder %s11365_s1, %s10214_s21  ;;  %p10218_p1 = scmp.lt.u32.totalorder %s10214_s21, %s11365_s1 }
   0x8   :  { %p10220_p2 = pnand %p10218_p1, %p10215_p0 }
   0xa   :  { %10223 = shalt.err (!%p10220_p2)
}
   0xb   :  { %s10224_s26 = scalar_lea.vmem %s32_s16, 2048  ;;  %p10229_p4 = scmp.lt.s32.totalorder %s32_s16, %s32_s16 }
   0xc   :  { %p10225_p3 = scmp.ne.s32.totalorder %s32_s16, %s10224_s26  ;;  %p10230_p5 = scmp.lt.s32.totalorder %s10224_s26, %s10224_s26 }
   0xe   :  { %p10231_p6 = por %p10230_p5, %p10229_p4 }
  0x10   :  { %p10232_p7 = pnand %p10231_p6, %p10225_p3 }
  0x12   :  { %10235 = shalt.err (!%p10232_p7)
}
  0x13   :  { %s10334_s27 = smov 128   ;;  %s10335_s28 = smov 8  }
  0x14   :  { %37 = dma.hbm_to_vmem [thread:$0]  %s11365_s1, 2048, %s32_s16, [#allocation6], %s10334_s27, %s10334_s27, %s10335_s28  }
  0x15   :  { %s10236_s7 = scalar_lea.hbm %s11364_s0, 2048 }
  0x16   :  { %p10237_p8 = scmp.ne.s32.totalorder %s11364_s0, %s10236_s7  ;;  %p10240_p9 = scmp.lt.u32.totalorder %s10236_s7, %s11364_s0 }
  0x18   :  { %p10242_p10 = pnand %p10240_p9, %p10237_p8 }
  0x1a   :  { %10245 = shalt.err (!%p10242_p10)
}
  0x1b   :  { %s10246_s12 = scalar_lea.vmem %s10364_s18, 2048  ;;  %p10251_p12 = scmp.lt.s32.totalorder %s10364_s18, %s10364_s18 }
  0x1c   :  { %p10247_p11 = scmp.ne.s32.totalorder %s10364_s18, %s10246_s12  ;;  %p10252_p13 = scmp.lt.s32.totalorder %s10246_s12, %s10246_s12 }
  0x1e   :  { %p10253_p0 = por %p10252_p13, %p10251_p12 }
  0x20   :  { %p10254_p1 = pnand %p10253_p0, %p10247_p11 }
  0x22   :  { %10257 = shalt.err (!%p10254_p1)
}
  0x23   :  { %25 = dma.hbm_to_vmem [thread:$0]  %s11364_s0, 2048, %s10364_s18, [#allocation3], %s10334_s27, %s10334_s27, %s10335_s28  }
  0x24   :  { %s10336_s14 = smov [#allocation7]   ;;  %s10258_s19 = scalar_lea.hbm %s11366_s2, 2048 }
  0x25   :  { %s43_s15 = sshll.u32 %s10336_s14, 4  ;;  %p10259_p2 = scmp.ne.s32.totalorder %s11366_s2, %s10258_s19  ;;  %s44_s15 = int_to_ptr.vmem [resolvable:$true] %s43_s15 }
  0x26   :  { %p10262_p3 = scmp.lt.u32.totalorder %s10258_s19, %s11366_s2 }
  0x28   :  { %p10264_p4 = pnand %p10262_p3, %p10259_p2 }
  0x2a   :  { %10267 = shalt.err (!%p10264_p4)
}
  0x2b   :  { %s10268_s24 = scalar_lea.vmem %s44_s15, 2048  ;;  %p10273_p6 = scmp.lt.s32.totalorder %s44_s15, %s44_s15 }
  0x2c   :  { %p10269_p5 = scmp.ne.s32.totalorder %s44_s15, %s10268_s24  ;;  %p10274_p7 = scmp.lt.s32.totalorder %s10268_s24, %s10268_s24 }
  0x2e   :  { %p10275_p8 = por %p10274_p7, %p10273_p6 }
  0x30   :  { %p10276_p9 = pnand %p10275_p8, %p10269_p5 }
  0x32   :  { %10279 = shalt.err (!%p10276_p9)
}
  0x33   :  { %49 = dma.hbm_to_vmem [thread:$0]  %s11366_s2, 2048, %s44_s15, [#allocation6], %s10334_s27, %s10334_s27, %s10335_s28  }
  0x34   :  { %10324 = dma.done.wait [#allocation3], 2048  }
  0x35   :  { %10325 = vsyncadd [#allocation3], 4294965248 }
  0x36   :  { %10326 = dma.done.wait [#allocation6], 4096  }
  0x37   :  { %10327 = vsyncadd [#allocation6], 4294963200  ;;  %vm107_vm0 = vcmask 261120   ;;  %v75_v0 = vld [vmem:[#allocation5] sm:$0xff]  ;;  %v76_v1 = vld [vmem:[#allocation5 + $0x8] sm:$0xff]  ;;  %vm4236_vm1 = vcmask 130048  }
  0x38   :  { %v77_v2 = vld [vmem:[#allocation5 + $0x10] sm:$0xff]  ;;  %v115_v3 = vsel %vm107_vm0, %v75_v0, 0  ;;  %v118_v4 = vsel %vm107_vm0, %v76_v1, 0  ;;  %v78_v5 = vld [vmem:[#allocation5 + $0x18] sm:$0xff]  ;;  %v59_v7 = vld [vmem:[#allocation2] sm:$0xff]  ;;  %s10337_s2 = smov [#allocation9]  }
  0x39   :  { %v629_v6 = vsel %vm107_vm0, %v77_v2, 0  ;;  %v61_v8 = vld [vmem:[#allocation2 + $0x10] sm:$0xff]  ;;  %v121_v9 = vand.u32 4294901760, %v115_v3  ;;  %v124_v10 = vand.u32 4294901760, %v118_v4  ;;  %v632_v11 = vsel %vm107_vm0, %v78_v5, 0  ;;  %v60_v13 = vld [vmem:[#allocation2 + $0x8] sm:$0xff] }
  0x3a   :  { %v635_v12 = vand.u32 4294901760, %v629_v6  ;;  %v62_v14 = vld [vmem:[#allocation2 + $0x18] sm:$0xff]  ;;  %v638_v15 = vand.u32 4294901760, %v632_v11  ;;  %v109_v16 = vsel %vm107_vm0, %v59_v7, 0  ;;  %v623_v17 = vsel %vm107_vm0, %v61_v8, 0  ;;  %v79_v62 = vld [vmem:[#allocation5 + $0x20] sm:$0xff] }
  0x3b   :  { %v112_v18 = vsel %vm107_vm0, %v60_v13, 0  ;;  %v10423_v19 = vpack.c.bf16 %v124_v10, %v121_v9  ;;  %v10425_v20 = vand.u32 4294901760, %v109_v16  ;;  %v10427_v21 = vand.u32 4294901760, %v623_v17  ;;  %v80_v63 = vld [vmem:[#allocation5 + $0x28] sm:$0xff]  ;;  %v81_v1 = vld [vmem:[#allocation5 + $0x30] sm:$0xff]  ;;  %v82_v2 = vld [vmem:[#allocation5 + $0x38] sm:$0xff] }
  0x3c   :  { %v10429_v22 = vand.u32 4294901760, %v112_v18  ;;  %v10431_v23 = vpack.c.bf16 %v638_v15, %v635_v12  ;;  %v10433_v24 = vsub.f32 %v115_v3, %v121_v9  ;;  %v10435_v25 = vsub.f32 %v118_v4, %v124_v10  ;;  %v63_v5 = vld [vmem:[#allocation2 + $0x20] sm:$0xff]  ;;  %v65_v9 = vld [vmem:[#allocation2 + $0x30] sm:$0xff]  ;;  %s8526_s25 = sshll.u32 %s10337_s2, 4  ;;  %s8527_s25 = int_to_ptr.vmem [resolvable:$true] %s8526_s25 }
  0x3d   :  { %v626_v26 = vsel %vm107_vm0, %v62_v14, 0  ;;  %9600 = vmatprep.subr.bf16.mxu0 %v10423_v19  ;;  %v10440_v27 = vsub.f32 %v109_v16, %v10425_v20  ;;  %v10443_v28 = vsub.f32 %v623_v17, %v10427_v21  ;;  %v723_v33 = vsub.f32 %v629_v6, %v635_v12  ;;  %v64_v17 = vld [vmem:[#allocation2 + $0x28] sm:$0xff]  ;;  %s10280_s26 = scalar_lea.vmem %s8527_s25, 2048  ;;  %p10285_p11 = scmp.lt.s32.totalorder %s8527_s25, %s8527_s25 }
  0x3e   :  { %v10446_v29 = vsub.f32 %v112_v18, %v10429_v22  ;;  %v10448_v30 = vand.u32 4294901760, %v626_v26  ;;  %9624 = vmatprep.subr.bf16.mxu1 %v10431_v23  ;;  %9602 = vmatpush3.bf16.xpose.msra.mxu0 %v10423_v19  ;;  %v210_v31 = vand.u32 4294901760, %v10433_v24  ;;  %v217_v32 = vand.u32 4294901760, %v10435_v25  ;;  %p10281_p10 = scmp.ne.s32.totalorder %s8527_s25, %s10280_s26  ;;  %p10286_p12 = scmp.lt.s32.totalorder %s10280_s26, %s10280_s26 }
  0x3f   :  { %v730_v34 = vsub.f32 %v632_v11, %v638_v15  ;;  %9626 = vmatpush3.bf16.xpose.msra.mxu1 %v10431_v23  ;;  %v189_v35 = vand.u32 4294901760, %v10440_v27  ;;  %v703_v36 = vand.u32 4294901760, %v10443_v28  ;;  %v724_v41 = vand.u32 4294901760, %v723_v33 }
  0x40   :  { %v199_v37 = vand.u32 4294901760, %v10446_v29  ;;  %v10459_v38 = vsub.f32 %v626_v26, %v10448_v30  ;;  %v211_v39 = vsub.f32 %v10433_v24, %v210_v31  ;;  %v218_v40 = vsub.f32 %v10435_v25, %v217_v32  ;;  %v66_v26 = vld [vmem:[#allocation2 + $0x38] sm:$0xff]  ;;  %p10287_p13 = por %p10286_p12, %p10285_p11 }
  0x41   :  { %v731_v42 = vand.u32 4294901760, %v730_v34  ;;  %v190_v43 = vsub.f32 %v10440_v27, %v189_v35  ;;  %v704_v44 = vsub.f32 %v10443_v28, %v703_v36  ;;  %v725_v49 = vsub.f32 %v723_v33, %v724_v41 }
  0x42   :  { %v200_v45 = vsub.f32 %v10446_v29, %v199_v37  ;;  %v713_v46 = vand.u32 4294901760, %v10459_v38  ;;  %v212_v47 = vand.u32 4294901760, %v211_v39  ;;  %v219_v48 = vand.u32 4294901760, %v218_v40  ;;  %p10288_p0 = pnand %p10287_p13, %p10281_p10 }
  0x43   :  { %v732_v50 = vsub.f32 %v730_v34, %v731_v42  ;;  %v191_v51 = vand.u32 4294901760, %v190_v43  ;;  %v705_v52 = vand.u32 4294901760, %v704_v44  ;;  %v726_v56 = vand.u32 4294901760, %v725_v49 }
  0x44   :  { %v201_v53 = vand.u32 4294901760, %v200_v45  ;;  %v714_v54 = vsub.f32 %v10459_v38, %v713_v46  ;;  %v9603_v55 = vpack.c.bf16 %v219_v48, %v212_v47  ;;  %v9607_v60 = vpack.c.bf16 %v10435_v25, %v10433_v24 }
  0x45   :  { %v733_v57 = vand.u32 4294901760, %v732_v50  ;;  %8931 = vmatprep.mubr.f32.mxu0 %v191_v51  ;;  %8973 = vmatprep.mubr.f32.mxu1 %v705_v52  ;;  %v9631_v61 = vpack.c.bf16 %v730_v34, %v723_v33  ;;  %v9615_v0 = vpack.c.bf16 %v217_v32, %v210_v31  ;;  %v1143_v3 = vsel %vm107_vm0, %v79_v62, 0 }
  0x46   :  { %v715_v58 = vand.u32 4294901760, %v714_v54  ;;  %8932 = vmatmul.mubr.f32.vlgmr.msra.gmra.mrb[0].mxu0 %v201_v53  ;;  %9604 = vmatprep.subr.bf16.mxu0 %v9603_v55  ;;  %v1146_v4 = vsel %vm107_vm0, %v80_v63, 0  ;;  %v9639_v6 = vpack.c.bf16 %v731_v42, %v724_v41  ;;  %v1657_v7 = vsel %vm107_vm0, %v81_v1, 0  ;;  %v84_v63 = vld [vmem:[#allocation5 + $0x48] sm:$0xff]  ;;  %v85_v1 = vld [vmem:[#allocation5 + $0x50] sm:$0xff] }
  0x47   :  { %v9627_v59 = vpack.c.bf16 %v733_v57, %v726_v56  ;;  %9606 = vmatpush3.bf16.xpose.msra.mxu0 %v9603_v55  ;;  %8938 = vmatprep.mubr.f32.mxu0 %v10425_v20  ;;  %v1660_v8 = vsel %vm107_vm0, %v82_v2, 0  ;;  %v1149_v10 = vand.u32 4294901760, %v1143_v3  ;;  %v1152_v11 = vand.u32 4294901760, %v1146_v4  ;;  %v86_v2 = vld [vmem:[#allocation5 + $0x58] sm:$0xff] }
  0x48   :  { %8974 = vmatmul.mubr.f32.vlgmr.msra.gmra.mrb[0].mxu1 %v715_v58  ;;  %9608 = vmatprep.subr.bf16.mxu0 %v9607_v60  ;;  %v1137_v12 = vsel %vm107_vm0, %v63_v5, 0  ;;  %v1663_v13 = vand.u32 4294901760, %v1657_v7  ;;  %v1666_v14 = vand.u32 4294901760, %v1660_v8  ;;  %v1651_v15 = vsel %vm107_vm0, %v65_v9, 0  ;;  %v67_v5 = vld [vmem:[#allocation2 + $0x40] sm:$0xff]  ;;  %v69_v9 = vld [vmem:[#allocation2 + $0x50] sm:$0xff] }
  0x49   :  { %9628 = vmatprep.subr.bf16.mxu1 %v9627_v59  ;;  %8980 = vmatprep.mubr.f32.mxu1 %v10427_v21  ;;  %v10496_v16 = vand.u32 4294901760, %v1137_v12  ;;  %v10498_v18 = vsub.f32 %v1143_v3, %v1149_v10  ;;  %v10500_v24 = vsub.f32 %v1146_v4, %v1152_v11  ;;  %v10502_v25 = vand.u32 4294901760, %v1651_v15 }
  0x4a   :  { %9630 = vmatpush3.bf16.xpose.msra.mxu1 %v9627_v59  ;;  %v1140_v32 = vsel %vm107_vm0, %v64_v17, 0  ;;  %v10531_v40 = vpack.c.bf16 %v1152_v11, %v1149_v10  ;;  %v10543_v45 = vpack.c.bf16 %v1666_v14, %v1663_v13  ;;  %v2174_v4 = vsel %vm107_vm0, %v84_v63, 0  ;;  %v88_v63 = vld [vmem:[#allocation5 + $0x68] sm:$0xff] }
  0x4b   :  { %9632 = vmatprep.subr.bf16.mxu1 %v9631_v61  ;;  %v10512_v31 = vsub.f32 %v1137_v12, %v10496_v16  ;;  %v1245_v33 = vand.u32 4294901760, %v10500_v24  ;;  %v10522_v34 = vsub.f32 %v1651_v15, %v10502_v25  ;;  %v2180_v11 = vand.u32 4294901760, %v2174_v4 }
  0x4c   :  { %v2165_v12 = vsel %vm107_vm0, %v67_v5, 0  ;;  %v2679_v15 = vsel %vm107_vm0, %v69_v9, 0  ;;  %v71_v5 = vld [vmem:[#allocation2 + $0x60] sm:$0xff]  ;;  %v73_v9 = vld [vmem:[#allocation2 + $0x70] sm:$0xff] }
  0x4d   :  { %v1217_v39 = vand.u32 4294901760, %v10512_v31  ;;  %v1246_v42 = vsub.f32 %v10500_v24, %v1245_v33  ;;  %v1731_v44 = vand.u32 4294901760, %v10522_v34  ;;  %v10616_v17 = vand.u32 4294901760, %v2165_v12 }
  0x4e   :  { %8939 = vmatmul.mubr.f32.vlgmr.msra.gmra.mrb[0].mxu0 %v10429_v22 }
  0x4f   :  { %9610 = vmatpush3.bf16.xpose.msra.mxu0 %v9607_v60  ;;  %8945 = vmatprep.mubr.f32.mxu0 %v10440_v27  ;;  %v10506_v27 = vsub.f32 %v1657_v7, %v1663_v13  ;;  %v1218_v49 = vsub.f32 %v10512_v31, %v1217_v39  ;;  %v1247_v51 = vand.u32 4294901760, %v1246_v42  ;;  %v2685_v7 = vsel %vm107_vm0, %v85_v1, 0  ;;  %v89_v1 = vld [vmem:[#allocation5 + $0x70] sm:$0xff] }
  0x50   :  { %9612 = vmatprep.subr.bf16.mxu0 %v10423_v19  ;;  %v2691_v13 = vand.u32 4294901760, %v2685_v7 }
  0x51   :  { %8981 = vmatmul.mubr.f32.vlgmr.msra.gmra.mrb[0].mxu1 %v10448_v30  ;;  %v1219_v55 = vand.u32 4294901760, %v1218_v49 }
  0x52   :  { %9634 = vmatpush3.bf16.xpose.msra.mxu1 %v9631_v61  ;;  %8987 = vmatprep.mubr.f32.mxu1 %v10443_v28  ;;  %v10508_v28 = vsub.f32 %v1660_v8, %v1666_v14  ;;  %v9655_v61 = vpack.c.bf16 %v10500_v24, %v10498_v18  ;;  %v2688_v8 = vsel %vm107_vm0, %v86_v2, 0  ;;  %v90_v2 = vld [vmem:[#allocation5 + $0x78] sm:$0xff] }
  0x53   :  { %9636 = vmatprep.subr.bf16.mxu1 %v10431_v23  ;;  %v2694_v14 = vand.u32 4294901760, %v2688_v8 }
  0x54   :  { %v9679_v62 = vpack.c.bf16 %v10508_v28, %v10506_v27 }
  0x56   :  { %8946 = vmatmul.mubr.f32.vlgmr.msra.gmra.mrb[0].mxu0 %v10446_v29  ;;  %v1238_v29 = vand.u32 4294901760, %v10498_v18 }
  0x57   :  { %9614 = vmatpush3.bf16.xpose.msra.mxu0 %v10423_v19  ;;  %8952 = vmatprep.mubr.f32.mxu0 %v189_v35  ;;  %v1654_v35 = vsel %vm107_vm0, %v66_v26, 0  ;;  %v10620_v26 = vsub.f32 %v2174_v4, %v2180_v11  ;;  %v3202_v4 = vsel %vm107_vm0, %v88_v63, 0 }
  0x58   :  { %9616 = vmatprep.subr.bf16.mxu0 %v9615_v0  ;;  %v1239_v41 = vsub.f32 %v10498_v18, %v1238_v29  ;;  %v10539_v43 = vand.u32 4294901760, %v1654_v35  ;;  %v68_v18 = vld [vmem:[#allocation2 + $0x48] sm:$0xff] }
  0x59   :  { %8988 = vmatmul.mubr.f32.vlgmr.msra.gmra.mrb[0].mxu1 %v10459_v38  ;;  %v1759_v38 = vand.u32 4294901760, %v10508_v28 }
  0x5a   :  { %9638 = vmatpush3.bf16.xpose.msra.mxu1 %v10431_v23  ;;  %8994 = vmatprep.mubr.f32.mxu1 %v703_v36  ;;  %v10526_v36 = vand.u32 4294901760, %v1140_v32  ;;  %v1240_v50 = vand.u32 4294901760, %v1239_v41  ;;  %v10562_v52 = vsub.f32 %v1654_v35, %v10539_v43  ;;  %v2273_v35 = vand.u32 4294901760, %v10620_v26 }
  0x5b   :  { %9640 = vmatprep.subr.bf16.mxu1 %v9639_v6  ;;  %v1760_v48 = vsub.f32 %v10508_v28, %v1759_v38  ;;  %v70_v28 = vld [vmem:[#allocation2 + $0x58] sm:$0xff] }
  0x5c   :  { %v9651_v56 = vpack.c.bf16 %v1247_v51, %v1240_v50  ;;  %v1741_v57 = vand.u32 4294901760, %v10562_v52  ;;  %v10663_v51 = vpack.c.bf16 %v2694_v14, %v2691_v13 }
  0x5d   :  { %v1761_v54 = vand.u32 4294901760, %v1760_v48  ;;  %v2274_v48 = vsub.f32 %v10620_v26, %v2273_v35 }
  0x5e   :  { %8953 = vmatmul.mubr.f32.vlgmr.msra.gmra.mrb[0].mxu0 %v199_v37  ;;  %v1752_v37 = vand.u32 4294901760, %v10506_v27  ;;  %v1742_v59 = vsub.f32 %v10562_v52, %v1741_v57 }
  0x5f   :  { %9618 = vmatpush3.bf16.xpose.msra.mxu0 %v9615_v0  ;;  %8959 = vmatprep.mubr.f32.mxu0 %v10425_v20  ;;  %v9663_v0 = vpack.c.bf16 %v1245_v33, %v1238_v29  ;;  %v10632_v29 = vsub.f32 %v2165_v12, %v10616_v17  ;;  %v2168_v33 = vsel %vm107_vm0, %v68_v18, 0  ;;  %v3193_v12 = vsel %vm107_vm0, %v71_v5, 0 }
  0x60   :  { %9620 = vmatprep.subr.bf16.mxu0 %v10423_v19  ;;  %v1753_v47 = vsub.f32 %v10506_v27, %v1752_v37  ;;  %v10622_v27 = vand.u32 4294901760, %v2679_v15  ;;  %v10736_v18 = vand.u32 4294901760, %v3193_v12 }
  0x61   :  { %8995 = vmatmul.mubr.f32.vlgmr.msra.gmra.mrb[0].mxu1 %v713_v46  ;;  %v10546_v46 = vsub.f32 %v1140_v32, %v10526_v36  ;;  %v10628_v32 = vsub.f32 %v2688_v8, %v2694_v14  ;;  %v3716_v8 = vsel %vm107_vm0, %v90_v2, 0 }
  0x62   :  { %9642 = vmatpush3.bf16.xpose.msra.mxu1 %v9639_v6  ;;  %9001 = vmatprep.mubr.f32.mxu1 %v10427_v21  ;;  %v1754_v53 = vand.u32 4294901760, %v1753_v47  ;;  %v9687_v6 = vpack.c.bf16 %v1759_v38, %v1752_v37  ;;  %v10642_v37 = vsub.f32 %v2679_v15, %v10622_v27  ;;  %v2682_v38 = vsel %vm107_vm0, %v70_v28, 0 }
  0x63   :  { %9644 = vmatprep.subr.bf16.mxu1 %v10431_v23  ;;  %v2787_v42 = vand.u32 4294901760, %v10628_v32  ;;  %v10659_v49 = vand.u32 4294901760, %v2682_v38  ;;  %v3722_v14 = vand.u32 4294901760, %v3716_v8  ;;  %v3707_v15 = vsel %vm107_vm0, %v73_v9, 0 }
  0x64   :  { %v2759_v50 = vand.u32 4294901760, %v10642_v37 }
  0x66   :  { %8960 = vmatmul.mubr.f32.vlgmr.msra.gmra.mrb[0].mxu0 %v10429_v22 }
  0x67   :  { %9622 = vmatpush3.bf16.xpose.msra.mxu0 %v10423_v19  ;;  %8966 = vmatprep.mubr.f32.mxu0 %v10425_v20  ;;  %v1732_v19 = vsub.f32 %v10522_v34, %v1731_v44  ;;  %v1227_v20 = vand.u32 4294901760, %v10546_v46 }
  0x68   :  { %9648 = vmatprep.subr.bf16.mxu0 %v10531_v40 }
  0x69   :  { %9002 = vmatmul.mubr.f32.vlgmr.msra.gmra.mrb[0].mxu1 %v10448_v30  ;;  %v1733_v58 = vand.u32 4294901760, %v1732_v19 }
  0x6a   :  { %9646 = vmatpush3.bf16.xpose.msra.mxu1 %v10431_v23  ;;  %9008 = vmatprep.mubr.f32.mxu1 %v10427_v21  ;;  %v1228_v21 = vsub.f32 %v10546_v46, %v1227_v20  ;;  %v9675_v23 = vpack.c.bf16 %v1761_v54, %v1754_v53 }
  0x6b   :  { %9672 = vmatprep.subr.bf16.mxu1 %v10543_v45 }
  0x6c   :  { %v1229_v60 = vand.u32 4294901760, %v1228_v21 }
  0x6e   :  { %8967 = vmatmul.mubr.f32.vlgmr.msra.gmra.mrb[0].mxu0 %v10429_v22  ;;  %v1743_v22 = vand.u32 4294901760, %v1742_v59 }
  0x6f   :  { %9650 = vmatpush3.bf16.xpose.msra.mxu0 %v10531_v40  ;;  %9015 = vmatprep.mubr.f32.mxu0 %v1219_v55  ;;  %v2275_v55 = vand.u32 4294901760, %v2274_v48 }
  0x70   :  { %9652 = vmatprep.subr.bf16.mxu0 %v9651_v56 }
  0x71   :  { %9009 = vmatmul.mubr.f32.vlgmr.msra.gmra.mrb[0].mxu1 %v10448_v30  ;;  %v83_v30 = vld [vmem:[#allocation5 + $0x40] sm:$0xff] }
  0x72   :  { %9674 = vmatpush3.bf16.xpose.msra.mxu1 %v10543_v45  ;;  %9057 = vmatprep.mubr.f32.mxu1 %v1733_v58  ;;  %v2171_v3 = vsel %vm107_vm0, %v83_v30, 0 }
  0x73   :  { %9676 = vmatprep.subr.bf16.mxu1 %v9675_v23  ;;  %v2177_v10 = vand.u32 4294901760, %v2171_v3 }
  0x75   :  { %v10618_v24 = vsub.f32 %v2171_v3, %v2177_v10 }
  0x76   :  { %9016 = vmatmul.mubr.f32.vlgmr.msra.gmra.mrb[2].mxu0 %v1229_v60 }
  0x77   :  { %9654 = vmatpush3.bf16.xpose.msra.mxu0 %v9651_v56  ;;  %9022 = vmatprep.mubr.f32.mxu0 %v10496_v16  ;;  %v10682_v56 = vsub.f32 %v2682_v38, %v10659_v49 }
  0x78   :  { %9656 = vmatprep.subr.bf16.mxu0 %v9655_v61 }
  0x79   :  { %9058 = vmatmul.mubr.f32.vlgmr.msra.gmra.mrb[2].mxu1 %v1743_v22  ;;  %v2769_v59 = vand.u32 4294901760, %v10682_v56 }
  0x7a   :  { %9678 = vmatpush3.bf16.xpose.msra.mxu1 %v9675_v23  ;;  %9064 = vmatprep.mubr.f32.mxu1 %v10502_v25 }
  0x7b   :  { %9680 = vmatprep.subr.bf16.mxu1 %v9679_v62  ;;  %v2770_v22 = vsub.f32 %v10682_v56, %v2769_v59 }
  0x7e   :  { %9023 = vmatmul.mubr.f32.vlgmr.msra.gmra.mrb[2].mxu0 %v10526_v36 }
  0x7f   :  { %9658 = vmatpush3.bf16.xpose.msra.mxu0 %v9655_v61  ;;  %9029 = vmatprep.mubr.f32.mxu0 %v10512_v31  ;;  %v10626_v31 = vsub.f32 %v2685_v7, %v2691_v13  ;;  %v3713_v7 = vsel %vm107_vm0, %v89_v1, 0 }
  0x80   :  { %9660 = vmatprep.subr.bf16.mxu0 %v10531_v40  ;;  %v3719_v13 = vand.u32 4294901760, %v3713_v7 }
  0x81   :  { %9065 = vmatmul.mubr.f32.vlgmr.msra.gmra.mrb[2].mxu1 %v10539_v43  ;;  %v2780_v41 = vand.u32 4294901760, %v10626_v31  ;;  %v9727_v30 = vpack.c.bf16 %v10628_v32, %v10626_v31 }
  0x82   :  { %9682 = vmatpush3.bf16.xpose.msra.mxu1 %v9679_v62  ;;  %9071 = vmatprep.mubr.f32.mxu1 %v10522_v34  ;;  %v2266_v34 = vand.u32 4294901760, %v10618_v24  ;;  %v9703_v62 = vpack.c.bf16 %v10620_v26, %v10618_v24 }
  0x83   :  { %9684 = vmatprep.subr.bf16.mxu1 %v10543_v45  ;;  %v2781_v19 = vsub.f32 %v10626_v31, %v2780_v41  ;;  %v10742_v31 = vand.u32 4294901760, %v3707_v15 }
  0x84   :  { %v2267_v47 = vsub.f32 %v10618_v24, %v2266_v34  ;;  %v72_v24 = vld [vmem:[#allocation2 + $0x68] sm:$0xff] }
  0x86   :  { %9030 = vmatmul.mubr.f32.vlgmr.msra.gmra.mrb[2].mxu0 %v10546_v46  ;;  %v10651_v46 = vpack.c.bf16 %v2180_v11, %v2177_v10  ;;  %v2268_v54 = vand.u32 4294901760, %v2267_v47  ;;  %v3208_v11 = vand.u32 4294901760, %v3202_v4 }
  0x87   :  { %9662 = vmatpush3.bf16.xpose.msra.mxu0 %v10531_v40  ;;  %9036 = vmatprep.mubr.f32.mxu0 %v1217_v39  ;;  %v10646_v39 = vand.u32 4294901760, %v2168_v33 }
  0x88   :  { %9664 = vmatprep.subr.bf16.mxu0 %v9663_v0  ;;  %v9699_v23 = vpack.c.bf16 %v2275_v55, %v2268_v54  ;;  %v10740_v28 = vsub.f32 %v3202_v4, %v3208_v11  ;;  %v10783_v55 = vpack.c.bf16 %v3722_v14, %v3719_v13 }
  0x89   :  { %9072 = vmatmul.mubr.f32.vlgmr.msra.gmra.mrb[2].mxu1 %v10562_v52  ;;  %v10666_v52 = vsub.f32 %v2168_v33, %v10646_v39  ;;  %v10748_v33 = vsub.f32 %v3716_v8, %v3722_v14 }
  0x8a   :  { %9686 = vmatpush3.bf16.xpose.msra.mxu1 %v10543_v45  ;;  %9078 = vmatprep.mubr.f32.mxu1 %v1731_v44  ;;  %v2245_v44 = vand.u32 4294901760, %v10632_v29  ;;  %v3301_v38 = vand.u32 4294901760, %v10740_v28 }
  0x8b   :  { %9688 = vmatprep.subr.bf16.mxu1 %v9687_v6  ;;  %v3815_v48 = vand.u32 4294901760, %v10748_v33 }
  0x8c   :  { %v2246_v53 = vsub.f32 %v10632_v29, %v2245_v44 }
  0x8e   :  { %9037 = vmatmul.mubr.f32.vlgmr.msra.gmra.mrb[2].mxu0 %v1227_v20  ;;  %v2788_v20 = vsub.f32 %v10628_v32, %v2787_v42  ;;  %v2247_v21 = vand.u32 4294901760, %v2246_v53  ;;  %v74_v32 = vld [vmem:[#allocation2 + $0x78] sm:$0xff] }
  0x8f   :  { %9666 = vmatpush3.bf16.xpose.msra.mxu0 %v9663_v0  ;;  %9043 = vmatprep.mubr.f32.mxu0 %v10496_v16  ;;  %v9711_v0 = vpack.c.bf16 %v2273_v35, %v2266_v34  ;;  %v10752_v34 = vsub.f32 %v3193_v12, %v10736_v18  ;;  %v3196_v35 = vsel %vm107_vm0, %v72_v24, 0 }
  0x90   :  { %9668 = vmatprep.subr.bf16.mxu0 %v10531_v40  ;;  %v2789_v58 = vand.u32 4294901760, %v2788_v20  ;;  %v3302_v20 = vsub.f32 %v10740_v28, %v3301_v38 }
  0x91   :  { %9079 = vmatmul.mubr.f32.vlgmr.msra.gmra.mrb[2].mxu1 %v1741_v57  ;;  %v2782_v57 = vand.u32 4294901760, %v2781_v19 }
  0x92   :  { %9690 = vmatpush3.bf16.xpose.msra.mxu1 %v9687_v6  ;;  %9085 = vmatprep.mubr.f32.mxu1 %v10502_v25  ;;  %v9735_v6 = vpack.c.bf16 %v2787_v42, %v2780_v41  ;;  %v10762_v41 = vsub.f32 %v3707_v15, %v10742_v31  ;;  %v3710_v42 = vsel %vm107_vm0, %v74_v32, 0 }
  0x93   :  { %9692 = vmatprep.subr.bf16.mxu1 %v10543_v45  ;;  %v10779_v53 = vand.u32 4294901760, %v3710_v42 }
  0x94   :  { %v3787_v54 = vand.u32 4294901760, %v10762_v41 }
  0x96   :  { %9044 = vmatmul.mubr.f32.vlgmr.msra.gmra.mrb[2].mxu0 %v10526_v36 }
  0x97   :  { %9670 = vmatpush3.bf16.xpose.msra.mxu0 %v10531_v40  ;;  %9050 = vmatprep.mubr.f32.mxu0 %v10496_v16  ;;  %v2760_v16 = vsub.f32 %v10642_v37, %v2759_v50  ;;  %v2255_v40 = vand.u32 4294901760, %v10666_v52 }
  0x98   :  { %9696 = vmatprep.subr.bf16.mxu0 %v10651_v46 }
  0x99   :  { %9086 = vmatmul.mubr.f32.vlgmr.msra.gmra.mrb[2].mxu1 %v10539_v43  ;;  %v2761_v60 = vand.u32 4294901760, %v2760_v16 }
  0x9a   :  { %9694 = vmatpush3.bf16.xpose.msra.mxu1 %v10543_v45  ;;  %9092 = vmatprep.mubr.f32.mxu1 %v10502_v25  ;;  %v2256_v25 = vsub.f32 %v10666_v52, %v2255_v40  ;;  %v9723_v45 = vpack.c.bf16 %v2789_v58, %v2782_v57 }
  0x9b   :  { %9720 = vmatprep.subr.bf16.mxu1 %v10663_v51 }
  0x9c   :  { %v2257_v61 = vand.u32 4294901760, %v2256_v25 }
  0x9e   :  { %9051 = vmatmul.mubr.f32.vlgmr.msra.gmra.mrb[2].mxu0 %v10526_v36  ;;  %v2771_v36 = vand.u32 4294901760, %v2770_v22 }
  0x9f   :  { %9698 = vmatpush3.bf16.xpose.msra.mxu0 %v10651_v46  ;;  %9099 = vmatprep.mubr.f32.mxu0 %v2247_v21  ;;  %v3303_v21 = vand.u32 4294901760, %v3302_v20 }
  0xa0   :  { %9700 = vmatprep.subr.bf16.mxu0 %v9699_v23 }
  0xa1   :  { %9093 = vmatmul.mubr.f32.vlgmr.msra.gmra.mrb[2].mxu1 %v10539_v43  ;;  %v87_v43 = vld [vmem:[#allocation5 + $0x60] sm:$0xff] }
  0xa2   :  { %9722 = vmatpush3.bf16.xpose.msra.mxu1 %v10663_v51  ;;  %9141 = vmatprep.mubr.f32.mxu1 %v2761_v60  ;;  %v3199_v3 = vsel %vm107_vm0, %v87_v43, 0 }
  0xa3   :  { %9724 = vmatprep.subr.bf16.mxu1 %v9723_v45  ;;  %v3205_v10 = vand.u32 4294901760, %v3199_v3 }
  0xa5   :  { %v10738_v26 = vsub.f32 %v3199_v3, %v3205_v10 }
  0xa6   :  { %9100 = vmatmul.mubr.f32.vlgmr.msra.gmra.mrb[4].mxu0 %v2257_v61 }
  0xa7   :  { %9702 = vmatpush3.bf16.xpose.msra.mxu0 %v9699_v23  ;;  %9106 = vmatprep.mubr.f32.mxu0 %v10616_v17  ;;  %v3796_v23 = vsub.f32 %v3710_v42, %v10779_v53  ;;  %v9751_v43 = vpack.c.bf16 %v10740_v28, %v10738_v26 }
  0xa8   :  { %9704 = vmatprep.subr.bf16.mxu0 %v9703_v62 }
  0xa9   :  { %9142 = vmatmul.mubr.f32.vlgmr.msra.gmra.mrb[4].mxu1 %v2771_v36  ;;  %v3797_v22 = vand.u32 4294901760, %v3796_v23 }
  0xaa   :  { %9726 = vmatpush3.bf16.xpose.msra.mxu1 %v9723_v45  ;;  %9148 = vmatprep.mubr.f32.mxu1 %v10622_v27 }
  0xab   :  { %9728 = vmatprep.subr.bf16.mxu1 %v9727_v30 }
  0xae   :  { %9107 = vmatmul.mubr.f32.vlgmr.msra.gmra.mrb[4].mxu0 %v10646_v39 }
  0xaf   :  { %9706 = vmatpush3.bf16.xpose.msra.mxu0 %v9703_v62  ;;  %9113 = vmatprep.mubr.f32.mxu0 %v10632_v29  ;;  %v10746_v29 = vsub.f32 %v3713_v7, %v3719_v13 }
  0xb0   :  { %9708 = vmatprep.subr.bf16.mxu0 %v10651_v46 }
  0xb1   :  { %9149 = vmatmul.mubr.f32.vlgmr.msra.gmra.mrb[4].mxu1 %v10659_v49  ;;  %v3808_v47 = vand.u32 4294901760, %v10746_v29 }
  0xb2   :  { %9730 = vmatpush3.bf16.xpose.msra.mxu1 %v9727_v30  ;;  %9155 = vmatprep.mubr.f32.mxu1 %v10642_v37  ;;  %v3294_v37 = vand.u32 4294901760, %v10738_v26 }
  0xb3   :  { %9732 = vmatprep.subr.bf16.mxu1 %v10663_v51  ;;  %v3809_v16 = vsub.f32 %v10746_v29, %v3808_v47  ;;  %v9783_v63 = vpack.c.bf16 %v3815_v48, %v3808_v47 }
  0xb4   :  { %v3295_v19 = vsub.f32 %v10738_v26, %v3294_v37 }
  0xb6   :  { %9114 = vmatmul.mubr.f32.vlgmr.msra.gmra.mrb[4].mxu0 %v10666_v52  ;;  %v10771_v52 = vpack.c.bf16 %v3208_v11, %v3205_v10  ;;  %v3296_v58 = vand.u32 4294901760, %v3295_v19 }
  0xb7   :  { %9710 = vmatpush3.bf16.xpose.msra.mxu0 %v10651_v46  ;;  %9120 = vmatprep.mubr.f32.mxu0 %v2245_v44  ;;  %v10766_v44 = vand.u32 4294901760, %v3196_v35 }
  0xb8   :  { %9712 = vmatprep.subr.bf16.mxu0 %v9711_v0  ;;  %v9747_v45 = vpack.c.bf16 %v3303_v21, %v3296_v58 }
  0xb9   :  { %9156 = vmatmul.mubr.f32.vlgmr.msra.gmra.mrb[4].mxu1 %v10682_v56  ;;  %v10786_v56 = vsub.f32 %v3196_v35, %v10766_v44 }
  0xba   :  { %9734 = vmatpush3.bf16.xpose.msra.mxu1 %v10663_v51  ;;  %9162 = vmatprep.mubr.f32.mxu1 %v2759_v50  ;;  %v3273_v50 = vand.u32 4294901760, %v10752_v34 }
  0xbb   :  { %9736 = vmatprep.subr.bf16.mxu1 %v9735_v6 }
  0xbc   :  { %v3274_v57 = vsub.f32 %v10752_v34, %v3273_v50 }
  0xbe   :  { %9121 = vmatmul.mubr.f32.vlgmr.msra.gmra.mrb[4].mxu0 %v2255_v40  ;;  %v3816_v40 = vsub.f32 %v10748_v33, %v3815_v48  ;;  %v3275_v25 = vand.u32 4294901760, %v3274_v57 }
  0xbf   :  { %9714 = vmatpush3.bf16.xpose.msra.mxu0 %v9711_v0  ;;  %9127 = vmatprep.mubr.f32.mxu0 %v10616_v17 }
  0xc0   :  { %9716 = vmatprep.subr.bf16.mxu0 %v10651_v46  ;;  %v3817_v60 = vand.u32 4294901760, %v3816_v40 }
  0xc1   :  { %9163 = vmatmul.mubr.f32.vlgmr.msra.gmra.mrb[4].mxu1 %v2769_v59  ;;  %v3810_v59 = vand.u32 4294901760, %v3809_v16 }
  0xc2   :  { %9738 = vmatpush3.bf16.xpose.msra.mxu1 %v9735_v6  ;;  %9169 = vmatprep.mubr.f32.mxu1 %v10622_v27 }
  0xc3   :  { %9740 = vmatprep.subr.bf16.mxu1 %v10663_v51  ;;  %v9771_v36 = vpack.c.bf16 %v3817_v60, %v3810_v59 }
  0xc6   :  { %9128 = vmatmul.mubr.f32.vlgmr.msra.gmra.mrb[4].mxu0 %v10646_v39 }
  0xc7   :  { %9718 = vmatpush3.bf16.xpose.msra.mxu0 %v10651_v46  ;;  %9134 = vmatprep.mubr.f32.mxu0 %v10616_v17  ;;  %v3788_v17 = vsub.f32 %v10762_v41, %v3787_v54  ;;  %v3283_v46 = vand.u32 4294901760, %v10786_v56 }
  0xc8   :  { %9744 = vmatprep.subr.bf16.mxu0 %v10771_v52 }
  0xc9   :  { %9170 = vmatmul.mubr.f32.vlgmr.msra.gmra.mrb[4].mxu1 %v10659_v49  ;;  %v3789_v61 = vand.u32 4294901760, %v3788_v17 }
  0xca   :  { %9742 = vmatpush3.bf16.xpose.msra.mxu1 %v10663_v51  ;;  %9176 = vmatprep.mubr.f32.mxu1 %v10622_v27  ;;  %v3284_v51 = vsub.f32 %v10786_v56, %v3283_v46  ;;  %v3798_v27 = vsub.f32 %v3796_v23, %v3797_v22 }
  0xcb   :  { %9768 = vmatprep.subr.bf16.mxu1 %v10783_v55 }
  0xcc   :  { %v3285_v62 = vand.u32 4294901760, %v3284_v51  ;;  %v3799_v30 = vand.u32 4294901760, %v3798_v27 }
  0xce   :  { %9135 = vmatmul.mubr.f32.vlgmr.msra.gmra.mrb[4].mxu0 %v10646_v39  ;;  %v9775_v39 = vpack.c.bf16 %v10748_v33, %v10746_v29 }
  0xcf   :  { %9746 = vmatpush3.bf16.xpose.msra.mxu0 %v10771_v52  ;;  %9183 = vmatprep.mubr.f32.mxu0 %v3275_v25 }
  0xd0   :  { %9748 = vmatprep.subr.bf16.mxu0 %v9747_v45 }
  0xd1   :  { %9177 = vmatmul.mubr.f32.vlgmr.msra.gmra.mrb[4].mxu1 %v10659_v49  ;;  %v9759_v49 = vpack.c.bf16 %v3301_v38, %v3294_v37 }
  0xd2   :  { %9770 = vmatpush3.bf16.xpose.msra.mxu1 %v10783_v55  ;;  %9225 = vmatprep.mubr.f32.mxu1 %v3789_v61 }
  0xd3   :  { %9772 = vmatprep.subr.bf16.mxu1 %v9771_v36 }
  0xd6   :  { %9184 = vmatmul.mubr.f32.vlgmr.msra.gmra.mrb[6].mxu0 %v3285_v62 }
  0xd7   :  { %9750 = vmatpush3.bf16.xpose.msra.mxu0 %v9747_v45  ;;  %9190 = vmatprep.mubr.f32.mxu0 %v10736_v18 }
  0xd8   :  { %9752 = vmatprep.subr.bf16.mxu0 %v9751_v43 }
  0xd9   :  { %9226 = vmatmul.mubr.f32.vlgmr.msra.gmra.mrb[6].mxu1 %v3799_v30 }
  0xda   :  { %9774 = vmatpush3.bf16.xpose.msra.mxu1 %v9771_v36  ;;  %9232 = vmatprep.mubr.f32.mxu1 %v10742_v31 }
  0xdb   :  { %9776 = vmatprep.subr.bf16.mxu1 %v9775_v39 }
  0xde   :  { %9191 = vmatmul.mubr.f32.vlgmr.msra.gmra.mrb[6].mxu0 %v10766_v44 }
  0xdf   :  { %9754 = vmatpush3.bf16.xpose.msra.mxu0 %v9751_v43  ;;  %9197 = vmatprep.mubr.f32.mxu0 %v10752_v34 }
  0xe0   :  { %9756 = vmatprep.subr.bf16.mxu0 %v10771_v52 }
  0xe1   :  { %9233 = vmatmul.mubr.f32.vlgmr.msra.gmra.mrb[6].mxu1 %v10779_v53 }
  0xe2   :  { %9778 = vmatpush3.bf16.xpose.msra.mxu1 %v9775_v39  ;;  %9239 = vmatprep.mubr.f32.mxu1 %v10762_v41 }
  0xe3   :  { %9780 = vmatprep.subr.bf16.mxu1 %v10783_v55 }
  0xe6   :  { %9198 = vmatmul.mubr.f32.vlgmr.msra.gmra.mrb[6].mxu0 %v10786_v56 }
  0xe7   :  { %9758 = vmatpush3.bf16.xpose.msra.mxu0 %v10771_v52  ;;  %9204 = vmatprep.mubr.f32.mxu0 %v3273_v50 }
  0xe8   :  { %9760 = vmatprep.subr.bf16.mxu0 %v9759_v49 }
  0xe9   :  { %9240 = vmatmul.mubr.f32.vlgmr.msra.gmra.mrb[6].mxu1 %v3796_v23 }
  0xea   :  { %9782 = vmatpush3.bf16.xpose.msra.mxu1 %v10783_v55  ;;  %9246 = vmatprep.mubr.f32.mxu1 %v3787_v54 }
  0xeb   :  { %9784 = vmatprep.subr.bf16.mxu1 %v9783_v63 }
  0xee   :  { %9205 = vmatmul.mubr.f32.vlgmr.msra.gmra.mrb[6].mxu0 %v3283_v46 }
  0xef   :  { %9762 = vmatpush3.bf16.xpose.msra.mxu0 %v9759_v49  ;;  %9211 = vmatprep.mubr.f32.mxu0 %v10736_v18 }
  0xf0   :  { %9764 = vmatprep.subr.bf16.mxu0 %v10771_v52 }
  0xf1   :  { %9247 = vmatmul.mubr.f32.vlgmr.msra.gmra.mrb[6].mxu1 %v3797_v22 }
  0xf2   :  { %9786 = vmatpush3.bf16.xpose.msra.mxu1 %v9783_v63  ;;  %9253 = vmatprep.mubr.f32.mxu1 %v10742_v31 }
  0xf3   :  { %9788 = vmatprep.subr.bf16.mxu1 %v10783_v55 }
  0xf6   :  { %9212 = vmatmul.mubr.f32.vlgmr.msra.gmra.mrb[6].mxu0 %v10766_v44 }
  0xf7   :  { %9766 = vmatpush3.bf16.xpose.msra.mxu0 %v10771_v52  ;;  %9218 = vmatprep.mubr.f32.mxu0 %v10736_v18 }
  0xf9   :  { %9254 = vmatmul.mubr.f32.vlgmr.msra.gmra.mrb[6].mxu1 %v10779_v53 }
  0xfa   :  { %9790 = vmatpush3.bf16.xpose.msra.mxu1 %v10783_v55  ;;  %9260 = vmatprep.mubr.f32.mxu1 %v10742_v31 }
  0xfe   :  { %9219 = vmatmul.mubr.f32.vlgmr.msra.gmra.mrb[6].mxu0 %v10766_v44 }
 0x101   :  { %9261 = vmatmul.mubr.f32.vlgmr.msra.gmra.mrb[6].mxu1 %v10779_v53 }
 0x141   :  { %v8968_v0 = vpop.f32.mrb[0].mxu0 }
 0x142   :  { %v4221_v1 = vmul.f32 0.17677669, %v8968_v0  ;;  %v612_v2 = vpop.f32.mrb[1].mxu0 }
 0x143   :  { %v4220_v4 = vmul.f32 0.17677669, %v612_v2 }
 0x144   :  { %v9010_v3 = vpop.f32.mrb[0].mxu1  ;;  %v4240_v7 = vsel %vm4236_vm1, %v4221_v1, -inf }
 0x145   :  { %v4223_v5 = vmul.f32 0.17677669, %v9010_v3  ;;  %v1126_v6 = vpop.f32.mrb[1].mxu1  ;;  %4241 = vmax.xlane.f32.xlu1 %v4240_v7  ;;  %v4237_v9 = vsel %vm4236_vm1, %v4220_v4, -inf }
 0x146   :  { %v4222_v8 = vmul.f32 0.17677669, %v1126_v6  ;;  %4238 = vmax.xlane.f32.xlu0 %v4237_v9 }
 0x147   :  { %v4246_v10 = vsel %vm4236_vm1, %v4223_v5, -inf }
 0x148   :  { %v4243_v11 = vsel %vm4236_vm1, %v4222_v8, -inf }
 0x149   :  { %4247 = vmax.xlane.f32.xlu1 %v4246_v10  ;;  %v91_v10 = vld [vmem:[#allocation7] sm:$0xff] }
 0x14a   :  { %4244 = vmax.xlane.f32.xlu0 %v4243_v11  ;;  %v92_v11 = vld [vmem:[#allocation7 + $0x8] sm:$0xff] }
 0x171   :  { %v9052_v12 = vpop.f32.mrb[2].mxu0 }
 0x172   :  { %v1640_v13 = vpop.f32.mrb[3].mxu0  ;;  %v10859_v24 = vmul.f32 0.17677669, %v9052_v12 }
 0x173   :  { %v10857_v15 = vmul.f32 0.17677669, %v1640_v13 }
 0x174   :  { %v9094_v14 = vpop.f32.mrb[2].mxu1  ;;  %v4252_v29 = vsel %vm4236_vm1, %v10859_v24, -inf }
 0x175   :  { %v2154_v18 = vpop.f32.mrb[3].mxu1  ;;  %v4249_v28 = vsel %vm4236_vm1, %v10857_v15, -inf  ;;  %v10865_v31 = vmul.f32 0.17677669, %v9094_v14  ;;  %v4436_v14 = vand.u32 4294901760, %v91_v10 }
 0x176   :  { %v10861_v26 = vmul.f32 0.17677669, %v2154_v18  ;;  %4250 = vmax.xlane.f32.xlu0 %v4249_v28  ;;  %v4439_v28 = vand.u32 4294901760, %v92_v11 }
 0x177   :  { %v4258_v33 = vsel %vm4236_vm1, %v10865_v31, -inf }
 0x178   :  { %v4255_v32 = vsel %vm4236_vm1, %v10861_v26, -inf }
 0x179   :  { %4256 = vmax.xlane.f32.xlu1 %v4255_v32 }
 0x17a   :  { %4253 = vmax.xlane.f32.xlu0 %v4252_v29 }
 0x17d   :  { %4259 = vmax.xlane.f32.xlu1 %v4258_v33  ;;  %v93_v33 = vld [vmem:[#allocation7 + $0x10] sm:$0xff] }
 0x1a1   :  { %v9136_v34 = vpop.f32.mrb[4].mxu0 }
 0x1a2   :  { %v10873_v35 = vmul.f32 0.17677669, %v9136_v34  ;;  %v2668_v37 = vpop.f32.mrb[5].mxu0  ;;  %v4524_v34 = vsub.f32 %v91_v10, %v4436_v14 }
 0x1a3   :  { %v10877_v42 = vmul.f32 0.17677669, %v2668_v37  ;;  %v10925_v37 = vpack.c.bf16 %v4439_v28, %v4436_v14 }
 0x1a4   :  { %v9178_v38 = vpop.f32.mrb[4].mxu1  ;;  %v4264_v47 = vsel %vm4236_vm1, %v10873_v35, -inf }
 0x1a5   :  { %v10875_v41 = vmul.f32 0.17677669, %v9178_v38  ;;  %v3182_v44 = vpop.f32.mrb[5].mxu1  ;;  %4265 = vmax.xlane.f32.xlu0 %v4264_v47  ;;  %v4261_v52 = vsel %vm4236_vm1, %v10877_v42, -inf  ;;  %9792 = vmatprep.subr.bf16.mxu0 %v10925_v37 }
 0x1a6   :  { %v10881_v48 = vmul.f32 0.17677669, %v3182_v44  ;;  %v4531_v44 = vsub.f32 %v92_v11, %v4439_v28  ;;  %9794 = vmatpush3.bf16.msra.mxu0 %v10925_v37 }
 0x1a7   :  { %v4270_v50 = vsel %vm4236_vm1, %v10875_v41, -inf }
 0x1a8   :  { %4271 = vmax.xlane.f32.xlu1 %v4270_v50  ;;  %v4267_v19 = vsel %vm4236_vm1, %v10881_v48, -inf  ;;  %v4525_v50 = vand.u32 4294901760, %v4524_v34 }
 0x1a9   :  { %4262 = vmax.xlane.f32.xlu0 %v4261_v52  ;;  %v4532_v52 = vand.u32 4294901760, %v4531_v44 }
 0x1ac   :  { %4268 = vmax.xlane.f32.xlu1 %v4267_v19 }
 0x1d1   :  { %v9220_v20 = vpop.f32.mrb[6].mxu0 }
 0x1d2   :  { %v4242_v53 = vpop.xlane.xlu1 %4241  ;;  %v3696_v54 = vpop.f32.mrb[7].mxu0  ;;  %v10905_v43 = vmul.f32 0.17677669, %v9220_v20 }
 0x1d3   :  { %v4286_v56 = vsub.f32 %v4221_v1, %v4242_v53  ;;  %v4239_v16 = vpop.xlane.xlu0 %4238  ;;  %v10897_v36 = vmul.f32 0.17677669, %v3696_v54  ;;  %v4533_v53 = vsub.f32 %v4531_v44, %v4532_v52 }
 0x1d4   :  { %v9262_v55 = vpop.f32.mrb[6].mxu1  ;;  %v4285_v57 = vsub.f32 %v4220_v4, %v4239_v16  ;;  %v4276_v2 = vsel %vm4236_vm1, %v10905_v43, -inf }
 0x1d5   :  { %v4210_v40 = vpop.f32.mrb[7].mxu1  ;;  %v4303_v58 = vmul.f32 1.442695, %v4286_v56  ;;  %v4273_v63 = vsel %vm4236_vm1, %v10897_v36, -inf  ;;  %v10913_v0 = vmul.f32 0.17677669, %v9262_v55 }
 0x1d6   :  { %v4301_v21 = vmul.f32 1.442695, %v4285_v57  ;;  %v4248_v23 = vpop.xlane.xlu1 %4247  ;;  %v10907_v39 = vmul.f32 0.17677669, %v4210_v40  ;;  %v4534_v16 = vand.u32 4294901760, %v4533_v53 }
 0x1d7   :  { %v4288_v17 = vsub.f32 %v4223_v5, %v4248_v23  ;;  %v4245_v46 = vpop.xlane.xlu0 %4244  ;;  %v4282_v3 = vsel %vm4236_vm1, %v10913_v0, -inf }
 0x1d8   :  { %10150 = vpow2.f32 %v4301_v21  ;;  %v4287_v59 = vsub.f32 %v4222_v8, %v4245_v46  ;;  %v4279_v1 = vsel %vm4236_vm1, %v10907_v39, -inf }
 0x1d9   :  { %10152 = vpow2.f32 %v4303_v58  ;;  %v4307_v60 = vmul.f32 1.442695, %v4288_v17 }
 0x1da   :  { %v4305_v25 = vmul.f32 1.442695, %v4287_v59 }
 0x1dc   :  { %10154 = vpow2.f32 %v4305_v25 }
 0x1dd   :  { %10156 = vpow2.f32 %v4307_v60 }
 0x1e2   :  { %v10889_v45 = vpop.eup %10150 }
 0x1e3   :  { %v4333_v22 = vsel %vm4236_vm1, %v10889_v45, 0.0  ;;  %v10893_v61 = vpop.eup %10152 }
 0x1e4   :  { %4334 = vadd.xlane.f32.xlu0 %v4333_v22  ;;  %v4336_v62 = vsel %vm4236_vm1, %v10893_v61, 0.0 }
 0x1e6   :  { %v10895_v51 = vpop.eup %10154 }
 0x1e7   :  { %v4339_v27 = vsel %vm4236_vm1, %v10895_v51, 0.0  ;;  %v10903_v30 = vpop.eup %10156 }
 0x1e8   :  { %4340 = vadd.xlane.f32.xlu1 %v4339_v27  ;;  %4337 = vadd.xlane.f32.xlu0 %v4336_v62  ;;  %v4342_v49 = vsel %vm4236_vm1, %v10903_v30, 0.0 }
 0x1ec   :  { %4343 = vadd.xlane.f32.xlu1 %v4342_v49  ;;  %4274 = vmax.xlane.f32.xlu0 %v4273_v63  ;;  %v10953_v49 = vpack.c.bf16 %v4531_v44, %v4524_v34 }
 0x1f0   :  { %4280 = vmax.xlane.f32.xlu1 %v4279_v1  ;;  %4277 = vmax.xlane.f32.xlu0 %v4276_v2  ;;  %v10959_v2 = vpack.c.bf16 %v4532_v52, %v4525_v50 }
 0x1f4   :  { %4283 = vmax.xlane.f32.xlu1 %v4282_v3 }
 0x203   :  { %v4251_v4 = vpop.xlane.xlu0 %4250 }
 0x204   :  { %v4289_v5 = vsub.f32 %v10857_v15, %v4251_v4  ;;  %v94_v15 = vld [vmem:[#allocation7 + $0x18] sm:$0xff] }
 0x205   :  { %v4947_v38 = vand.u32 4294901760, %v94_v15 }
 0x206   :  { %v4257_v6 = vpop.xlane.xlu1 %4256  ;;  %v4309_v8 = vmul.f32 1.442695, %v4289_v5 }
 0x207   :  { %v4291_v7 = vsub.f32 %v10861_v26, %v4257_v6  ;;  %v4254_v9 = vpop.xlane.xlu0 %4253  ;;  %v4944_v26 = vand.u32 4294901760, %v93_v33  ;;  %v5039_v20 = vsub.f32 %v94_v15, %v4947_v38 }
 0x208   :  { %10158 = vpow2.f32 %v4309_v8  ;;  %v4290_v13 = vsub.f32 %v10859_v24, %v4254_v9 }
 0x209   :  { %v4313_v12 = vmul.f32 1.442695, %v4291_v7  ;;  %v10928_v24 = vpack.c.bf16 %v4947_v38, %v4944_v26  ;;  %v5032_v19 = vsub.f32 %v93_v33, %v4944_v26  ;;  %v5040_v56 = vand.u32 4294901760, %v5039_v20 }
 0x20a   :  { %v4260_v18 = vpop.xlane.xlu1 %4259  ;;  %v4311_v29 = vmul.f32 1.442695, %v4290_v13 }
 0x20b   :  { %10160 = vpow2.f32 %v4313_v12  ;;  %v4292_v32 = vsub.f32 %v10865_v31, %v4260_v18  ;;  %v4526_v31 = vsub.f32 %v4524_v34, %v4525_v50  ;;  %9816 = vmatprep.subr.bf16.mxu1 %v10928_v24  ;;  %v5033_v55 = vand.u32 4294901760, %v5032_v19 }
 0x20c   :  { %10162 = vpow2.f32 %v4311_v29  ;;  %9818 = vmatpush3.bf16.msra.mxu1 %v10928_v24  ;;  %v5041_v58 = vsub.f32 %v5039_v20, %v5040_v56  ;;  %v10957_v1 = vpack.c.bf16 %v5039_v20, %v5032_v19 }
 0x20d   :  { %v4315_v47 = vmul.f32 1.442695, %v4292_v32  ;;  %v4527_v54 = vand.u32 4294901760, %v4526_v31  ;;  %v5034_v57 = vsub.f32 %v5032_v19, %v5033_v55  ;;  %v10961_v3 = vpack.c.bf16 %v5040_v56, %v5033_v55 }
 0x20e   :  { %v5042_v59 = vand.u32 4294901760, %v5041_v58 }
 0x20f   :  { %10164 = vpow2.f32 %v4315_v47  ;;  %v10937_v23 = vpack.c.bf16 %v4534_v16, %v4527_v54  ;;  %v5035_v46 = vand.u32 4294901760, %v5034_v57 }
 0x211   :  { %9796 = vmatprep.subr.bf16.mxu0 %v10937_v23  ;;  %v10946_v22 = vpack.c.bf16 %v5042_v59, %v5035_v46 }
 0x212   :  { %v10933_v40 = vpop.eup %10158 }
 0x213   :  { %v4345_v21 = vsel %vm4236_vm1, %v10933_v40, 0.0  ;;  %9820 = vmatprep.subr.bf16.mxu1 %v10946_v22 }
 0x214   :  { %4346 = vadd.xlane.f32.xlu0 %v4345_v21 }
 0x215   :  { %v10939_v17 = vpop.eup %10160 }
 0x216   :  { %v4351_v60 = vsel %vm4236_vm1, %v10939_v17, 0.0  ;;  %v10944_v25 = vpop.eup %10162 }
 0x217   :  { %4352 = vadd.xlane.f32.xlu1 %v4351_v60  ;;  %v4348_v27 = vsel %vm4236_vm1, %v10944_v25, 0.0 }
 0x218   :  { %4349 = vadd.xlane.f32.xlu0 %v4348_v27 }
 0x219   :  { %v10950_v62 = vpop.eup %10164 }
 0x21a   :  { %v4354_v63 = vsel %vm4236_vm1, %v10950_v62, 0.0 }
 0x21b   :  { %4355 = vadd.xlane.f32.xlu1 %v4354_v63 }
 0x232   :  { %v4266_v4 = vpop.xlane.xlu0 %4265 }
 0x233   :  { %v4294_v6 = vsub.f32 %v10873_v35, %v4266_v4 }
 0x235   :  { %v4272_v5 = vpop.xlane.xlu1 %4271  ;;  %v4319_v10 = vmul.f32 1.442695, %v4294_v6 }
 0x236   :  { %v4263_v7 = vpop.xlane.xlu0 %4262  ;;  %v4296_v8 = vsub.f32 %v10875_v41, %v4272_v5 }
 0x237   :  { %v4293_v9 = vsub.f32 %v10877_v42, %v4263_v7 }
 0x238   :  { %v4323_v14 = vmul.f32 1.442695, %v4296_v8 }
 0x239   :  { %v4269_v11 = vpop.xlane.xlu1 %4268  ;;  %v4317_v13 = vmul.f32 1.442695, %v4293_v9 }
 0x23a   :  { %v4295_v12 = vsub.f32 %v10881_v48, %v4269_v11 }
 0x23b   :  { %10166 = vpow2.f32 %v4317_v13 }
 0x23c   :  { %v4321_v18 = vmul.f32 1.442695, %v4295_v12  ;;  %10168 = vpow2.f32 %v4319_v10 }
 0x23e   :  { %10170 = vpow2.f32 %v4321_v18 }
 0x23f   :  { %10172 = vpow2.f32 %v4323_v14 }
 0x245   :  { %v10967_v28 = vpop.eup %10166 }
 0x246   :  { %v10969_v32 = vpop.eup %10168  ;;  %v4357_v35 = vsel %vm4236_vm1, %v10967_v28, 0.0 }
 0x247   :  { %4358 = vadd.xlane.f32.xlu0 %v4357_v35  ;;  %v4360_v29 = vsel %vm4236_vm1, %v10969_v32, 0.0 }
 0x248   :  { %v10973_v41 = vpop.eup %10170 }
 0x249   :  { %v4363_v42 = vsel %vm4236_vm1, %v10973_v41, 0.0  ;;  %v10977_v48 = vpop.eup %10172 }
 0x24a   :  { %4364 = vadd.xlane.f32.xlu1 %v4363_v42  ;;  %v4366_v33 = vsel %vm4236_vm1, %v10977_v48, 0.0 }
 0x24b   :  { %4361 = vadd.xlane.f32.xlu0 %v4360_v29 }
 0x24e   :  { %4367 = vadd.xlane.f32.xlu1 %v4366_v33 }
 0x271   :  { %v4335_v15 = vpop.xlane.xlu0 %4334 }
 0x272   :  { %10174 = vrcp.f32 %v4335_v15 }
 0x275   :  { %v4341_v34 = vpop.xlane.xlu1 %4340  ;;  %v4338_v26 = vpop.xlane.xlu0 %4337 }
 0x276   :  { %10176 = vrcp.f32 %v4341_v34 }
 0x277   :  { %10178 = vrcp.f32 %v4338_v26 }
 0x279   :  { %v4344_v38 = vpop.xlane.xlu1 %4343  ;;  %v4275_v44 = vpop.xlane.xlu0 %4274 }
 0x27a   :  { %10180 = vrcp.f32 %v4344_v38  ;;  %v4297_v47 = vsub.f32 %v10897_v36, %v4275_v44 }
 0x27c   :  { %v10175_v50 = vpop.eup %10174  ;;  %v4325_v52 = vmul.f32 1.442695, %v4297_v47 }
 0x27d   :  { %v4382_v31 = vmul.f32 %v10175_v50, %v10889_v45  ;;  %v4281_v19 = vpop.xlane.xlu1 %4280  ;;  %v4278_v20 = vpop.xlane.xlu0 %4277 }
 0x27e   :  { %10182 = vpow2.f32 %v4325_v52  ;;  %v4299_v53 = vsub.f32 %v10907_v39, %v4281_v19  ;;  %v4298_v54 = vsub.f32 %v10905_v43, %v4278_v20  ;;  %v98_v19 = vld [vmem:[#allocation7 + $0x38] sm:$0xff] }
 0x27f   :  { %4413 = vst.msk [vmem:[#allocation9] sm:$0xff] %vm4236_vm1, %v4382_v31  ;;  %v4430_v55 = vsel %vm4236_vm1, %v4382_v31, 0  ;;  %v96_v31 = vld [vmem:[#allocation7 + $0x28] sm:$0xff] }
 0x280   :  { %v10177_v56 = vpop.eup %10176  ;;  %v4329_v16 = vmul.f32 1.442695, %v4299_v53  ;;  %v4327_v57 = vmul.f32 1.442695, %v4298_v54  ;;  %v10989_v58 = vand.u32 4294901760, %v4430_v55  ;;  %v5455_v53 = vand.u32 4294901760, %v96_v31 }
 0x281   :  { %v10179_v36 = vpop.eup %10178  ;;  %v4386_v21 = vmul.f32 %v10177_v56, %v10895_v51  ;;  %v4284_v45 = vpop.xlane.xlu1 %4283 }
 0x282   :  { %v4384_v46 = vmul.f32 %v10179_v36, %v10893_v61  ;;  %10184 = vpow2.f32 %v4329_v16  ;;  %v4300_v39 = vsub.f32 %v10913_v0, %v4284_v45  ;;  %v10995_v43 = vsub.f32 %v4430_v55, %v10989_v58 }
 0x283   :  { %4415 = vst.msk [vmem:[#allocation9 + $0x10] sm:$0xff] %vm4236_vm1, %v4386_v21  ;;  %10186 = vpow2.f32 %v4327_v57  ;;  %v4938_v59 = vsel %vm4236_vm1, %v4386_v21, 0  ;;  %v5963_v55 = vand.u32 4294901760, %v98_v19  ;;  %v11060_v57 = vsub.f32 %v96_v31, %v5455_v53 }
 0x284   :  { %v10181_v60 = vpop.eup %10180  ;;  %4414 = vst.msk [vmem:[#allocation9 + $0x8] sm:$0xff] %vm4236_vm1, %v4384_v46  ;;  %v4331_v27 = vmul.f32 1.442695, %v4300_v39  ;;  %v4504_v51 = vand.u32 4294901760, %v10995_v43  ;;  %v11001_v63 = vand.u32 4294901760, %v4938_v59  ;;  %v4433_v61 = vsel %vm4236_vm1, %v4384_v46, 0 }
 0x285   :  { %v4388_v0 = vmul.f32 %v10181_v60, %v10903_v30  ;;  %v11005_v4 = vand.u32 4294901760, %v4433_v61  ;;  %v11064_v45 = vsub.f32 %v98_v19, %v5963_v55  ;;  %v5548_v39 = vand.u32 4294901760, %v11060_v57 }
 0x286   :  { %10188 = vpow2.f32 %v4331_v27  ;;  %v4505_v5 = vsub.f32 %v10995_v43, %v4504_v51  ;;  %v5011_v6 = vsub.f32 %v4938_v59, %v11001_v63 }
 0x287   :  { %4416 = vst.msk [vmem:[#allocation9 + $0x18] sm:$0xff] %vm4236_vm1, %v4388_v0  ;;  %v11011_v7 = vsub.f32 %v4433_v61, %v11005_v4  ;;  %v4941_v8 = vsel %vm4236_vm1, %v4388_v0, 0  ;;  %v6056_v59 = vand.u32 4294901760, %v11064_v45  ;;  %v5549_v61 = vsub.f32 %v11060_v57, %v5548_v39 }
 0x288   :  { %v11014_v9 = vpop.eup %10182  ;;  %v4506_v10 = vand.u32 4294901760, %v4505_v5  ;;  %v5012_v11 = vand.u32 4294901760, %v5011_v6  ;;  %v11016_v12 = vand.u32 4294901760, %v4941_v8 }
 0x289   :  { %v4369_v30 = vsel %vm4236_vm1, %v11014_v9, 0.0  ;;  %v4514_v13 = vand.u32 4294901760, %v11011_v7 }
 0x28a   :  { %9267 = vmatprep.mubr.f32.mxu0 %v4506_v10  ;;  %4370 = vadd.xlane.f32.xlu0 %v4369_v30  ;;  %v5013_v14 = vsub.f32 %v5011_v6, %v5012_v11  ;;  %v11022_v18 = vsub.f32 %v4941_v8, %v11016_v12 }
 0x28b   :  { %v4515_v35 = vsub.f32 %v11011_v7, %v4514_v13 }
 0x28c   :  { %v11025_v42 = vpop.eup %10184  ;;  %v5014_v29 = vand.u32 4294901760, %v5013_v14  ;;  %v5022_v33 = vand.u32 4294901760, %v11022_v18 }
 0x28d   :  { %v11028_v15 = vpop.eup %10186  ;;  %v4375_v34 = vsel %vm4236_vm1, %v11025_v42, 0.0  ;;  %v4516_v26 = vand.u32 4294901760, %v4515_v35 }
 0x28e   :  { %9309 = vmatprep.mubr.f32.mxu1 %v5014_v29  ;;  %4376 = vadd.xlane.f32.xlu1 %v4375_v34  ;;  %v4372_v38 = vsel %vm4236_vm1, %v11028_v15, 0.0  ;;  %v5023_v44 = vsub.f32 %v11022_v18, %v5022_v33 }
 0x28f   :  { %9268 = vmatmul.mubr.f32.vlgmr.msra.gmra.mrb[8].mxu0 %v4516_v26  ;;  %4373 = vadd.xlane.f32.xlu0 %v4372_v38 }
 0x290   :  { %v11035_v47 = vpop.eup %10188  ;;  %9274 = vmatprep.mubr.f32.mxu0 %v10989_v58  ;;  %v5024_v50 = vand.u32 4294901760, %v5023_v44  ;;  %9798 = vmatpush3.bf16.msra.mxu0 %v10937_v23  ;;  %v95_v23 = vld [vmem:[#allocation7 + $0x20] sm:$0xff] }
 0x291   :  { %v4378_v52 = vsel %vm4236_vm1, %v11035_v47, 0.0  ;;  %9800 = vmatprep.subr.bf16.mxu0 %v10953_v49 }
 0x292   :  { %9310 = vmatmul.mubr.f32.vlgmr.msra.gmra.mrb[8].mxu1 %v5024_v50  ;;  %4379 = vadd.xlane.f32.xlu1 %v4378_v52 }
 0x293   :  { %9316 = vmatprep.mubr.f32.mxu1 %v11001_v63  ;;  %9822 = vmatpush3.bf16.msra.mxu1 %v10946_v22  ;;  %v97_v22 = vld [vmem:[#allocation7 + $0x30] sm:$0xff] }
 0x294   :  { %9824 = vmatprep.subr.bf16.mxu1 %v10957_v1  ;;  %v5960_v54 = vand.u32 4294901760, %v97_v22 }
 0x296   :  { %v11062_v21 = vsub.f32 %v97_v22, %v5960_v54  ;;  %v11099_v8 = vpack.c.bf16 %v5963_v55, %v5960_v54 }
 0x297   :  { %9275 = vmatmul.mubr.f32.vlgmr.msra.gmra.mrb[8].mxu0 %v11005_v4 }
 0x298   :  { %9281 = vmatprep.mubr.f32.mxu0 %v10995_v43  ;;  %9802 = vmatpush3.bf16.msra.mxu0 %v10953_v49  ;;  %v5452_v49 = vand.u32 4294901760, %v95_v23  ;;  %v6049_v43 = vand.u32 4294901760, %v11062_v21 }
 0x299   :  { %9804 = vmatprep.subr.bf16.mxu0 %v10925_v37 }
 0x29a   :  { %9317 = vmatmul.mubr.f32.vlgmr.msra.gmra.mrb[8].mxu1 %v11016_v12  ;;  %v11058_v16 = vsub.f32 %v95_v23, %v5452_v49  ;;  %v11077_v27 = vpack.c.bf16 %v5455_v53, %v5452_v49 }
 0x29b   :  { %9323 = vmatprep.mubr.f32.mxu1 %v5011_v6  ;;  %9826 = vmatpush3.bf16.msra.mxu1 %v10957_v1  ;;  %v6057_v6 = vsub.f32 %v11064_v45, %v6056_v59 }
 0x29c   :  { %9828 = vmatprep.subr.bf16.mxu1 %v10928_v24  ;;  %v5541_v46 = vand.u32 4294901760, %v11058_v16  ;;  %v9847_v54 = vpack.c.bf16 %v11060_v57, %v11058_v16 }
 0x29d   :  { %v6058_v29 = vand.u32 4294901760, %v6057_v6 }
 0x29f   :  { %9282 = vmatmul.mubr.f32.vlgmr.msra.gmra.mrb[8].mxu0 %v11011_v7 }
 0x2a0   :  { %9288 = vmatprep.mubr.f32.mxu0 %v4504_v51  ;;  %9806 = vmatpush3.bf16.msra.mxu0 %v10925_v37  ;;  %v5542_v51 = vsub.f32 %v11058_v16, %v5541_v46 }
 0x2a1   :  { %v4347_v20 = vpop.xlane.xlu0 %4346  ;;  %9808 = vmatprep.subr.bf16.mxu0 %v10959_v2 }
 0x2a2   :  { %10190 = vrcp.f32 %v4347_v20  ;;  %9324 = vmatmul.mubr.f32.vlgmr.msra.gmra.mrb[8].mxu1 %v11022_v18  ;;  %v5543_v30 = vand.u32 4294901760, %v5542_v51  ;;  %v101_v51 = vld [vmem:[#allocation7 + $0x50] sm:$0xff] }
 0x2a3   :  { %9330 = vmatprep.mubr.f32.mxu1 %v5012_v11  ;;  %9830 = vmatpush3.bf16.msra.mxu1 %v10928_v24  ;;  %v6976_v57 = vand.u32 4294901760, %v101_v51 }
 0x2a4   :  { %v4353_v1 = vpop.xlane.xlu1 %4352  ;;  %9832 = vmatprep.subr.bf16.mxu1 %v10961_v3 }
 0x2a5   :  { %10192 = vrcp.f32 %v4353_v1  ;;  %v4350_v56 = vpop.xlane.xlu0 %4349 }
 0x2a6   :  { %10194 = vrcp.f32 %v4350_v56  ;;  %v9871_v56 = vpack.c.bf16 %v11064_v45, %v11062_v21 }
 0x2a7   :  { %9289 = vmatmul.mubr.f32.vlgmr.msra.gmra.mrb[8].mxu0 %v4514_v13  ;;  %v5550_v13 = vand.u32 4294901760, %v5549_v61  ;;  %v102_v61 = vld [vmem:[#allocation7 + $0x58] sm:$0xff] }
 0x2a8   :  { %v4356_v36 = vpop.xlane.xlu1 %4355  ;;  %9295 = vmatprep.mubr.f32.mxu0 %v10989_v58  ;;  %9810 = vmatpush3.bf16.msra.mxu0 %v10959_v2 }
 0x2a9   :  { %10196 = vrcp.f32 %v4356_v36  ;;  %9812 = vmatprep.subr.bf16.mxu0 %v10925_v37  ;;  %v9843_v38 = vpack.c.bf16 %v5550_v13, %v5543_v30  ;;  %v99_v36 = vld [vmem:[#allocation7 + $0x40] sm:$0xff] }
 0x2aa   :  { %9331 = vmatmul.mubr.f32.vlgmr.msra.gmra.mrb[8].mxu1 %v5022_v33 }
 0x2ab   :  { %9337 = vmatprep.mubr.f32.mxu1 %v11001_v63  ;;  %9834 = vmatpush3.bf16.msra.mxu1 %v10961_v3 }
 0x2ac   :  { %v10191_v60 = vpop.eup %10190  ;;  %9836 = vmatprep.subr.bf16.mxu1 %v10928_v24 }
 0x2ad   :  { %v4390_v2 = vmul.f32 %v10191_v60, %v10933_v40  ;;  %v6050_v40 = vsub.f32 %v11062_v21, %v6049_v43  ;;  %v100_v60 = vld [vmem:[#allocation7 + $0x48] sm:$0xff] }
 0x2ae   :  { %v6471_v16 = vand.u32 4294901760, %v100_v60 }
 0x2af   :  { %v10193_v3 = vpop.eup %10192  ;;  %4417 = vst.msk [vmem:[#allocation9 + $0x20] sm:$0xff] %vm4236_vm1, %v4390_v2  ;;  %9296 = vmatmul.mubr.f32.vlgmr.msra.gmra.mrb[8].mxu0 %v11005_v4  ;;  %v5446_v5 = vsel %vm4236_vm1, %v4390_v2, 0  ;;  %v6051_v35 = vand.u32 4294901760, %v6050_v40  ;;  %v9879_v2 = vpack.c.bf16 %v6056_v59, %v6049_v43  ;;  %v11152_v59 = vsub.f32 %v101_v51, %v6976_v57 }
 0x2b0   :  { %v4394_v0 = vmul.f32 %v10193_v3, %v10939_v17  ;;  %v10195_v7 = vpop.eup %10194  ;;  %9302 = vmatprep.mubr.f32.mxu0 %v10989_v58  ;;  %9814 = vmatpush3.bf16.msra.mxu0 %v10925_v37  ;;  %v11097_v17 = vand.u32 4294901760, %v5446_v5  ;;  %v6468_v3 = vand.u32 4294901760, %v99_v36  ;;  %v11150_v45 = vsub.f32 %v100_v60, %v6471_v16 }
 0x2b1   :  { %v4392_v10 = vmul.f32 %v10195_v7, %v10944_v25  ;;  %9840 = vmatprep.subr.bf16.mxu0 %v11077_v27  ;;  %v9867_v52 = vpack.c.bf16 %v6058_v29, %v6051_v35 }
 0x2b2   :  { %4419 = vst.msk [vmem:[#allocation9 + $0x30] sm:$0xff] %vm4236_vm1, %v4394_v0  ;;  %v5954_v11 = vsel %vm4236_vm1, %v4394_v0, 0  ;;  %9338 = vmatmul.mubr.f32.vlgmr.msra.gmra.mrb[8].mxu1 %v11016_v12  ;;  %v5519_v58 = vsub.f32 %v5446_v5, %v11097_v17  ;;  %v11148_v21 = vsub.f32 %v99_v36, %v6468_v3  ;;  %v6564_v6 = vand.u32 4294901760, %v11150_v45 }
 0x2b3   :  { %v10197_v14 = vpop.eup %10196  ;;  %v11107_v37 = vand.u32 4294901760, %v5954_v11  ;;  %4418 = vst.msk [vmem:[#allocation9 + $0x28] sm:$0xff] %vm4236_vm1, %v4392_v10  ;;  %9344 = vmatprep.mubr.f32.mxu1 %v11001_v63  ;;  %9838 = vmatpush3.bf16.msra.mxu1 %v10928_v24  ;;  %v5449_v25 = vsel %vm4236_vm1, %v4392_v10, 0  ;;  %v7065_v10 = vand.u32 4294901760, %v11152_v59  ;;  %v11164_v30 = vpack.c.bf16 %v6471_v16, %v6468_v3 }
 0x2b4   :  { %v4396_v18 = vmul.f32 %v10197_v14, %v10950_v62  ;;  %v5520_v33 = vand.u32 4294901760, %v5519_v58  ;;  %9864 = vmatprep.subr.bf16.mxu1 %v11099_v8  ;;  %v11116_v26 = vand.u32 4294901760, %v5449_v25  ;;  %v6557_v40 = vand.u32 4294901760, %v11148_v21 }
 0x2b5   :  { %v6027_v34 = vsub.f32 %v5954_v11, %v11107_v37  ;;  %v6565_v14 = vsub.f32 %v11150_v45, %v6564_v6 }
 0x2b6   :  { %4420 = vst.msk [vmem:[#allocation9 + $0x38] sm:$0xff] %vm4236_vm1, %v4396_v18  ;;  %v5957_v62 = vsel %vm4236_vm1, %v4396_v18, 0  ;;  %v5521_v44 = vsub.f32 %v5519_v58, %v5520_v33  ;;  %v5529_v24 = vsub.f32 %v5449_v25, %v11116_v26  ;;  %v6558_v13 = vsub.f32 %v11148_v21, %v6557_v40 }
 0x2b7   :  { %v6028_v63 = vand.u32 4294901760, %v6027_v34  ;;  %v11121_v50 = vand.u32 4294901760, %v5957_v62  ;;  %9303 = vmatmul.mubr.f32.vlgmr.msra.gmra.mrb[8].mxu0 %v11005_v4  ;;  %v7066_v18 = vsub.f32 %v11152_v59, %v7065_v10 }
 0x2b8   :  { %v5522_v23 = vand.u32 4294901760, %v5521_v44  ;;  %9842 = vmatpush3.bf16.msra.mxu0 %v11077_v27  ;;  %v5530_v22 = vand.u32 4294901760, %v5529_v24 }
 0x2b9   :  { %v6029_v31 = vsub.f32 %v6027_v34, %v6028_v63  ;;  %v6037_v19 = vsub.f32 %v5957_v62, %v11121_v50  ;;  %9844 = vmatprep.subr.bf16.mxu0 %v9843_v38 }
 0x2ba   :  { %9345 = vmatmul.mubr.f32.vlgmr.msra.gmra.mrb[8].mxu1 %v11016_v12  ;;  %9351 = vmatprep.mubr.f32.mxu0 %v5522_v23  ;;  %v5531_v49 = vsub.f32 %v5529_v24, %v5530_v22  ;;  %v9855_v12 = vpack.c.bf16 %v5548_v39, %v5541_v46  ;;  %v6979_v46 = vand.u32 4294901760, %v102_v61 }
 0x2bb   :  { %v6030_v20 = vand.u32 4294901760, %v6029_v31  ;;  %v6038_v53 = vand.u32 4294901760, %v6037_v19  ;;  %9866 = vmatpush3.bf16.msra.mxu1 %v11099_v8 }
 0x2bc   :  { %v5532_v1 = vand.u32 4294901760, %v5531_v49  ;;  %9868 = vmatprep.subr.bf16.mxu1 %v9867_v52  ;;  %v11154_v0 = vsub.f32 %v102_v61, %v6979_v46  ;;  %v9895_v61 = vpack.c.bf16 %v11150_v45, %v11148_v21 }
 0x2bd   :  { %9393 = vmatprep.mubr.f32.mxu1 %v6030_v20  ;;  %v6039_v4 = vsub.f32 %v6037_v19, %v6038_v53 }
 0x2be   :  { %9352 = vmatmul.mubr.f32.vlgmr.msra.gmra.mrb[10].mxu0 %v5532_v1  ;;  %v7072_v11 = vand.u32 4294901760, %v11154_v0  ;;  %v9919_v16 = vpack.c.bf16 %v11154_v0, %v11152_v59 }
 0x2bf   :  { %v6040_v55 = vand.u32 4294901760, %v6039_v4  ;;  %9358 = vmatprep.mubr.f32.mxu0 %v11097_v17  ;;  %9846 = vmatpush3.bf16.msra.mxu0 %v9843_v38 }
 0x2c0   :  { %9848 = vmatprep.subr.bf16.mxu0 %v9847_v54  ;;  %v7073_v25 = vsub.f32 %v11154_v0, %v7072_v11 }
 0x2c1   :  { %9394 = vmatmul.mubr.f32.vlgmr.msra.gmra.mrb[10].mxu1 %v6040_v55 }
 0x2c2   :  { %9400 = vmatprep.mubr.f32.mxu1 %v11107_v37  ;;  %9870 = vmatpush3.bf16.msra.mxu1 %v9867_v52 }
 0x2c3   :  { %9872 = vmatprep.subr.bf16.mxu1 %v9871_v56 }
 0x2c6   :  { %9359 = vmatmul.mubr.f32.vlgmr.msra.gmra.mrb[10].mxu0 %v11116_v26 }
 0x2c7   :  { %9365 = vmatprep.mubr.f32.mxu0 %v5519_v58  ;;  %9850 = vmatpush3.bf16.msra.mxu0 %v9847_v54  ;;  %v11173_v58 = vpack.c.bf16 %v6979_v46, %v6976_v57  ;;  %v9903_v57 = vpack.c.bf16 %v6564_v6, %v6557_v40  ;;  %v103_v46 = vld [vmem:[#allocation7 + $0x60] sm:$0xff] }
 0x2c8   :  { %9852 = vmatprep.subr.bf16.mxu0 %v11077_v27 }
 0x2c9   :  { %9401 = vmatmul.mubr.f32.vlgmr.msra.gmra.mrb[10].mxu1 %v11121_v50 }
 0x2ca   :  { %9407 = vmatprep.mubr.f32.mxu1 %v6027_v34  ;;  %9874 = vmatpush3.bf16.msra.mxu1 %v9871_v56  ;;  %v6566_v34 = vand.u32 4294901760, %v6565_v14 }
 0x2cb   :  { %9876 = vmatprep.subr.bf16.mxu1 %v11099_v8 }
 0x2ce   :  { %9366 = vmatmul.mubr.f32.vlgmr.msra.gmra.mrb[10].mxu0 %v5529_v24 }
 0x2cf   :  { %9372 = vmatprep.mubr.f32.mxu0 %v5520_v33  ;;  %9854 = vmatpush3.bf16.msra.mxu0 %v11077_v27  ;;  %v6559_v33 = vand.u32 4294901760, %v6558_v13  ;;  %v7484_v13 = vand.u32 4294901760, %v103_v46 }
 0x2d0   :  { %9856 = vmatprep.subr.bf16.mxu0 %v9855_v12 }
 0x2d1   :  { %9408 = vmatmul.mubr.f32.vlgmr.msra.gmra.mrb[10].mxu1 %v6037_v19  ;;  %v11236_v6 = vsub.f32 %v103_v46, %v7484_v13 }
 0x2d2   :  { %9414 = vmatprep.mubr.f32.mxu1 %v6028_v63  ;;  %9878 = vmatpush3.bf16.msra.mxu1 %v11099_v8 }
 0x2d3   :  { %9880 = vmatprep.subr.bf16.mxu1 %v9879_v2 }
 0x2d4   :  { %v4359_v39 = vpop.xlane.xlu0 %4358 }
 0x2d5   :  { %10198 = vrcp.f32 %v4359_v39  ;;  %v104_v39 = vld [vmem:[#allocation7 + $0x68] sm:$0xff] }
 0x2d6   :  { %9373 = vmatmul.mubr.f32.vlgmr.msra.gmra.mrb[10].mxu0 %v5530_v22  ;;  %v7487_v21 = vand.u32 4294901760, %v104_v39 }
 0x2d7   :  { %v4365_v43 = vpop.xlane.xlu1 %4364  ;;  %9379 = vmatprep.mubr.f32.mxu0 %v11097_v17  ;;  %9858 = vmatpush3.bf16.msra.mxu0 %v9855_v12 }
 0x2d8   :  { %10200 = vrcp.f32 %v4365_v43  ;;  %v4362_v5 = vpop.xlane.xlu0 %4361  ;;  %9860 = vmatprep.subr.bf16.mxu0 %v11077_v27  ;;  %v9927_v43 = vpack.c.bf16 %v7072_v11, %v7065_v10  ;;  %v11238_v59 = vsub.f32 %v104_v39, %v7487_v21  ;;  %v7573_v11 = vand.u32 4294901760, %v11236_v6 }
 0x2d9   :  { %9415 = vmatmul.mubr.f32.vlgmr.msra.gmra.mrb[10].mxu1 %v6038_v53  ;;  %10202 = vrcp.f32 %v4362_v5  ;;  %v105_v5 = vld [vmem:[#allocation7 + $0x70] sm:$0xff] }
 0x2da   :  { %9421 = vmatprep.mubr.f32.mxu1 %v11107_v37  ;;  %9882 = vmatpush3.bf16.msra.mxu1 %v9879_v2  ;;  %v7992_v45 = vand.u32 4294901760, %v105_v5  ;;  %v7580_v14 = vand.u32 4294901760, %v11238_v59 }
 0x2db   :  { %v4368_v7 = vpop.xlane.xlu1 %4367  ;;  %9884 = vmatprep.subr.bf16.mxu1 %v11099_v8 }
 0x2dc   :  { %10204 = vrcp.f32 %v4368_v7  ;;  %v106_v7 = vld [vmem:[#allocation7 + $0x78] sm:$0xff]  ;;  %v11240_v0 = vsub.f32 %v105_v5, %v7992_v45  ;;  %v9951_v5 = vpack.c.bf16 %v7580_v14, %v7573_v11 }
 0x2dd   :  { %v7995_v40 = vand.u32 4294901760, %v106_v7 }
 0x2de   :  { %9380 = vmatmul.mubr.f32.vlgmr.msra.gmra.mrb[10].mxu0 %v11116_v26 }
 0x2df   :  { %v10199_v35 = vpop.eup %10198  ;;  %9386 = vmatprep.mubr.f32.mxu0 %v11097_v17  ;;  %9862 = vmatpush3.bf16.msra.mxu0 %v11077_v27  ;;  %v7074_v27 = vand.u32 4294901760, %v7073_v25  ;;  %v11242_v10 = vsub.f32 %v106_v7, %v7995_v40 }
 0x2e0   :  { %v4398_v29 = vmul.f32 %v10199_v35, %v10967_v28  ;;  %9888 = vmatprep.subr.bf16.mxu0 %v11164_v30  ;;  %v7067_v28 = vand.u32 4294901760, %v7066_v18  ;;  %v8081_v18 = vand.u32 4294901760, %v11240_v0  ;;  %v11252_v35 = vpack.c.bf16 %v7487_v21, %v7484_v13 }
 0x2e1   :  { %9422 = vmatmul.mubr.f32.vlgmr.msra.gmra.mrb[10].mxu1 %v11121_v50  ;;  %v8088_v25 = vand.u32 4294901760, %v11242_v10 }
 0x2e2   :  { %v10201_v62 = vpop.eup %10200  ;;  %9428 = vmatprep.mubr.f32.mxu1 %v11107_v37  ;;  %9886 = vmatpush3.bf16.msra.mxu1 %v11099_v8  ;;  %4421 = vst.msk [vmem:[#allocation9 + $0x40] sm:$0xff] %vm4236_vm1, %v4398_v29  ;;  %v6462_v17 = vsel %vm4236_vm1, %v4398_v29, 0  ;;  %v9891_v8 = vpack.c.bf16 %v6566_v34, %v6559_v33  ;;  %v9915_v19 = vpack.c.bf16 %v7074_v27, %v7067_v28 }
 0x2e3   :  { %v4402_v38 = vmul.f32 %v10201_v62, %v10973_v41  ;;  %9912 = vmatprep.subr.bf16.mxu1 %v11173_v58  ;;  %v10203_v44 = vpop.eup %10202  ;;  %v11192_v63 = vand.u32 4294901760, %v6462_v17  ;;  %v7574_v29 = vsub.f32 %v11236_v6, %v7573_v11  ;;  %v7581_v33 = vsub.f32 %v11238_v59, %v7580_v14 }
 0x2e4   :  { %v4400_v24 = vmul.f32 %v10203_v44, %v10969_v32  ;;  %v11261_v34 = vpack.c.bf16 %v7995_v40, %v7992_v45  ;;  %v8082_v62 = vsub.f32 %v11240_v0, %v8081_v18  ;;  %v9975_v7 = vpack.c.bf16 %v8088_v25, %v8081_v18 }
 0x2e5   :  { %4423 = vst.msk [vmem:[#allocation9 + $0x50] sm:$0xff] %vm4236_vm1, %v4402_v38  ;;  %v6970_v37 = vsel %vm4236_vm1, %v4402_v38, 0  ;;  %v6535_v41 = vsub.f32 %v6462_v17, %v11192_v63  ;;  %v8089_v38 = vsub.f32 %v11242_v10, %v8088_v25  ;;  %v7575_v17 = vand.u32 4294901760, %v7574_v29 }
 0x2e6   :  { %v10205_v52 = vpop.eup %10204  ;;  %v11198_v23 = vand.u32 4294901760, %v6970_v37  ;;  %4422 = vst.msk [vmem:[#allocation9 + $0x48] sm:$0xff] %vm4236_vm1, %v4400_v24  ;;  %9387 = vmatmul.mubr.f32.vlgmr.msra.gmra.mrb[10].mxu0 %v11116_v26  ;;  %v6465_v22 = vsel %vm4236_vm1, %v4400_v24, 0  ;;  %v7582_v28 = vand.u32 4294901760, %v7581_v33  ;;  %v8083_v27 = vand.u32 4294901760, %v8082_v62 }
 0x2e7   :  { %v4404_v31 = vmul.f32 %v10205_v52, %v10977_v48  ;;  %v6536_v20 = vand.u32 4294901760, %v6535_v41  ;;  %9890 = vmatpush3.bf16.msra.mxu0 %v11164_v30  ;;  %v11206_v49 = vand.u32 4294901760, %v6465_v22  ;;  %v8090_v44 = vand.u32 4294901760, %v8089_v38 }
 0x2e8   :  { %v7043_v32 = vsub.f32 %v6970_v37, %v11198_v23  ;;  %9892 = vmatprep.subr.bf16.mxu0 %v9891_v8  ;;  %v9939_v37 = vpack.c.bf16 %v7582_v28, %v7575_v17 }
 0x2e9   :  { %4424 = vst.msk [vmem:[#allocation9 + $0x58] sm:$0xff] %vm4236_vm1, %v4404_v31  ;;  %9429 = vmatmul.mubr.f32.vlgmr.msra.gmra.mrb[10].mxu1 %v11121_v50  ;;  %v6973_v48 = vsel %vm4236_vm1, %v4404_v31, 0  ;;  %v6537_v53 = vsub.f32 %v6535_v41, %v6536_v20  ;;  %v6545_v26 = vsub.f32 %v6465_v22, %v11206_v49 }
 0x2ea   :  { %v7044_v1 = vand.u32 4294901760, %v7043_v32  ;;  %9914 = vmatpush3.bf16.msra.mxu1 %v11173_v58  ;;  %v11213_v4 = vand.u32 4294901760, %v6973_v48 }
 0x2eb   :  { %9916 = vmatprep.subr.bf16.mxu1 %v9915_v19  ;;  %v6538_v54 = vand.u32 4294901760, %v6537_v53  ;;  %v6546_v56 = vand.u32 4294901760, %v6545_v26 }
 0x2ec   :  { %v7045_v55 = vsub.f32 %v7043_v32, %v7044_v1  ;;  %v7053_v12 = vsub.f32 %v6973_v48, %v11213_v4 }
 0x2ed   :  { %9435 = vmatprep.mubr.f32.mxu0 %v6538_v54  ;;  %v6547_v50 = vsub.f32 %v6545_v26, %v6546_v56 }
 0x2ee   :  { %v7046_v36 = vand.u32 4294901760, %v7045_v55  ;;  %v7054_v60 = vand.u32 4294901760, %v7053_v12 }
 0x2ef   :  { %v6548_v2 = vand.u32 4294901760, %v6547_v50 }
 0x2f0   :  { %9477 = vmatprep.mubr.f32.mxu1 %v7046_v36  ;;  %v7055_v51 = vsub.f32 %v7053_v12, %v7054_v60 }
 0x2f1   :  { %9436 = vmatmul.mubr.f32.vlgmr.msra.gmra.mrb[12].mxu0 %v6548_v2 }
 0x2f2   :  { %v7056_v3 = vand.u32 4294901760, %v7055_v51  ;;  %9442 = vmatprep.mubr.f32.mxu0 %v11192_v63  ;;  %9894 = vmatpush3.bf16.msra.mxu0 %v9891_v8 }
 0x2f3   :  { %9896 = vmatprep.subr.bf16.mxu0 %v9895_v61 }
 0x2f4   :  { %9478 = vmatmul.mubr.f32.vlgmr.msra.gmra.mrb[12].mxu1 %v7056_v3 }
 0x2f5   :  { %9484 = vmatprep.mubr.f32.mxu1 %v11198_v23  ;;  %9918 = vmatpush3.bf16.msra.mxu1 %v9915_v19 }
 0x2f6   :  { %9920 = vmatprep.subr.bf16.mxu1 %v9919_v16 }
 0x2f9   :  { %9443 = vmatmul.mubr.f32.vlgmr.msra.gmra.mrb[12].mxu0 %v11206_v49 }
 0x2fa   :  { %9449 = vmatprep.mubr.f32.mxu0 %v6535_v41  ;;  %9898 = vmatpush3.bf16.msra.mxu0 %v9895_v61 }
 0x2fb   :  { %9900 = vmatprep.subr.bf16.mxu0 %v11164_v30 }
 0x2fc   :  { %9485 = vmatmul.mubr.f32.vlgmr.msra.gmra.mrb[12].mxu1 %v11213_v4 }
 0x2fd   :  { %9491 = vmatprep.mubr.f32.mxu1 %v7043_v32  ;;  %9922 = vmatpush3.bf16.msra.mxu1 %v9919_v16 }
 0x2fe   :  { %9924 = vmatprep.subr.bf16.mxu1 %v11173_v58 }
 0x301   :  { %9450 = vmatmul.mubr.f32.vlgmr.msra.gmra.mrb[12].mxu0 %v6545_v26 }
 0x302   :  { %9456 = vmatprep.mubr.f32.mxu0 %v6536_v20  ;;  %9902 = vmatpush3.bf16.msra.mxu0 %v11164_v30 }
 0x303   :  { %9904 = vmatprep.subr.bf16.mxu0 %v9903_v57 }
 0x304   :  { %9492 = vmatmul.mubr.f32.vlgmr.msra.gmra.mrb[12].mxu1 %v7053_v12 }
 0x305   :  { %9498 = vmatprep.mubr.f32.mxu1 %v7044_v1  ;;  %9926 = vmatpush3.bf16.msra.mxu1 %v11173_v58 }
 0x306   :  { %9928 = vmatprep.subr.bf16.mxu1 %v9927_v43 }
 0x309   :  { %9457 = vmatmul.mubr.f32.vlgmr.msra.gmra.mrb[12].mxu0 %v6546_v56 }
 0x30a   :  { %9463 = vmatprep.mubr.f32.mxu0 %v11192_v63  ;;  %9906 = vmatpush3.bf16.msra.mxu0 %v9903_v57 }
 0x30b   :  { %9908 = vmatprep.subr.bf16.mxu0 %v11164_v30 }
 0x30c   :  { %9499 = vmatmul.mubr.f32.vlgmr.msra.gmra.mrb[12].mxu1 %v7054_v60 }
 0x30d   :  { %9505 = vmatprep.mubr.f32.mxu1 %v11198_v23  ;;  %9930 = vmatpush3.bf16.msra.mxu1 %v9927_v43  ;;  %v9967_v43 = vpack.c.bf16 %v11242_v10, %v11240_v0 }
 0x30e   :  { %9932 = vmatprep.subr.bf16.mxu1 %v11173_v58 }
 0x311   :  { %9464 = vmatmul.mubr.f32.vlgmr.msra.gmra.mrb[12].mxu0 %v11206_v49 }
 0x312   :  { %9470 = vmatprep.mubr.f32.mxu0 %v11192_v63  ;;  %9910 = vmatpush3.bf16.msra.mxu0 %v11164_v30  ;;  %v9963_v30 = vpack.c.bf16 %v8090_v44, %v8083_v27 }
 0x313   :  { %9936 = vmatprep.subr.bf16.mxu0 %v11252_v35 }
 0x314   :  { %9506 = vmatmul.mubr.f32.vlgmr.msra.gmra.mrb[12].mxu1 %v11213_v4 }
 0x315   :  { %9512 = vmatprep.mubr.f32.mxu1 %v11198_v23  ;;  %9934 = vmatpush3.bf16.msra.mxu1 %v11173_v58 }
 0x316   :  { %9960 = vmatprep.subr.bf16.mxu1 %v11261_v34 }
 0x317   :  { %v4371_v24 = vpop.xlane.xlu0 %4370 }
 0x318   :  { %10206 = vrcp.f32 %v4371_v24 }
 0x319   :  { %9471 = vmatmul.mubr.f32.vlgmr.msra.gmra.mrb[12].mxu0 %v11206_v49 }
 0x31a   :  { %9938 = vmatpush3.bf16.msra.mxu0 %v11252_v35 }
 0x31b   :  { %v4377_v63 = vpop.xlane.xlu1 %4376  ;;  %9940 = vmatprep.subr.bf16.mxu0 %v9939_v37 }
 0x31c   :  { %9513 = vmatmul.mubr.f32.vlgmr.msra.gmra.mrb[12].mxu1 %v11213_v4  ;;  %10208 = vrcp.f32 %v4377_v63  ;;  %v4374_v8 = vpop.xlane.xlu0 %4373 }
 0x31d   :  { %9962 = vmatpush3.bf16.msra.mxu1 %v11261_v34  ;;  %10210 = vrcp.f32 %v4374_v8 }
 0x31e   :  { %9964 = vmatprep.subr.bf16.mxu1 %v9963_v30 }
 0x31f   :  { %v4380_v58 = vpop.xlane.xlu1 %4379 }
 0x320   :  { %10212 = vrcp.f32 %v4380_v58 }
 0x322   :  { %v10207_v52 = vpop.eup %10206 }
 0x323   :  { %v4406_v41 = vmul.f32 %v10207_v52, %v11014_v9 }
 0x325   :  { %4425 = vst.msk [vmem:[#allocation9 + $0x60] sm:$0xff] %vm4236_vm1, %v4406_v41  ;;  %v7478_v23 = vsel %vm4236_vm1, %v4406_v41, 0 }
 0x326   :  { %v10209_v31 = vpop.eup %10208  ;;  %v11283_v22 = vand.u32 4294901760, %v7478_v23 }
 0x327   :  { %v10211_v19 = vpop.eup %10210  ;;  %v4410_v20 = vmul.f32 %v10209_v31, %v11025_v42 }
 0x328   :  { %v4408_v32 = vmul.f32 %v10211_v19, %v11028_v15  ;;  %v7551_v49 = vsub.f32 %v7478_v23, %v11283_v22 }
 0x329   :  { %4427 = vst.msk [vmem:[#allocation9 + $0x70] sm:$0xff] %vm4236_vm1, %v4410_v20  ;;  %v7986_v48 = vsel %vm4236_vm1, %v4410_v20, 0 }
 0x32a   :  { %v10213_v53 = vpop.eup %10212  ;;  %4426 = vst.msk [vmem:[#allocation9 + $0x68] sm:$0xff] %vm4236_vm1, %v4408_v32  ;;  %v7481_v9 = vsel %vm4236_vm1, %v4408_v32, 0  ;;  %v7552_v1 = vand.u32 4294901760, %v7551_v49  ;;  %v8058_v26 = vand.u32 4294901760, %v7986_v48 }
 0x32b   :  { %v7560_v4 = vand.u32 4294901760, %v7481_v9  ;;  %v4412_v54 = vmul.f32 %v10213_v53, %v11035_v47  ;;  %v9943_v47 = vpack.c.bf16 %v11238_v59, %v11236_v6 }
 0x32c   :  { %v7553_v55 = vsub.f32 %v7551_v49, %v7552_v1  ;;  %v8059_v42 = vsub.f32 %v7986_v48, %v8058_v26 }
 0x32d   :  { %4428 = vst.msk [vmem:[#allocation9 + $0x78] sm:$0xff] %vm4236_vm1, %v4412_v54  ;;  %v7989_v15 = vsel %vm4236_vm1, %v4412_v54, 0  ;;  %v7561_v56 = vsub.f32 %v7481_v9, %v7560_v4 }
 0x32e   :  { %v8068_v12 = vand.u32 4294901760, %v7989_v15  ;;  %v7554_v36 = vand.u32 4294901760, %v7553_v55  ;;  %v8060_v50 = vand.u32 4294901760, %v8059_v42 }
 0x32f   :  { %v7562_v60 = vand.u32 4294901760, %v7561_v56 }
 0x330   :  { %9519 = vmatprep.mubr.f32.mxu0 %v7554_v36  ;;  %v8061_v2 = vsub.f32 %v8059_v42, %v8060_v50  ;;  %v8069_v51 = vsub.f32 %v7989_v15, %v8068_v12 }
 0x331   :  { %v7563_v61 = vsub.f32 %v7561_v56, %v7562_v60 }
 0x332   :  { %v8062_v3 = vand.u32 4294901760, %v8061_v2  ;;  %v8070_v16 = vand.u32 4294901760, %v8069_v51 }
 0x333   :  { %v7564_v57 = vand.u32 4294901760, %v7563_v61 }
 0x334   :  { %9561 = vmatprep.mubr.f32.mxu1 %v8062_v3  ;;  %v8071_v46 = vsub.f32 %v8069_v51, %v8070_v16 }
 0x335   :  { %9520 = vmatmul.mubr.f32.vlgmr.msra.gmra.mrb[14].mxu0 %v7564_v57 }
 0x336   :  { %9526 = vmatprep.mubr.f32.mxu0 %v11283_v22  ;;  %v8072_v39 = vand.u32 4294901760, %v8071_v46  ;;  %9942 = vmatpush3.bf16.msra.mxu0 %v9939_v37 }
 0x337   :  { %9944 = vmatprep.subr.bf16.mxu0 %v9943_v47 }
 0x338   :  { %9562 = vmatmul.mubr.f32.vlgmr.msra.gmra.mrb[14].mxu1 %v8072_v39 }
 0x339   :  { %9966 = vmatpush3.bf16.msra.mxu1 %v9963_v30  ;;  %9568 = vmatprep.mubr.f32.mxu1 %v8058_v26 }
 0x33a   :  { %9968 = vmatprep.subr.bf16.mxu1 %v9967_v43 }
 0x33d   :  { %9527 = vmatmul.mubr.f32.vlgmr.msra.gmra.mrb[14].mxu0 %v7560_v4 }
 0x33e   :  { %9533 = vmatprep.mubr.f32.mxu0 %v7551_v49  ;;  %9946 = vmatpush3.bf16.msra.mxu0 %v9943_v47 }
 0x33f   :  { %9948 = vmatprep.subr.bf16.mxu0 %v11252_v35 }
 0x340   :  { %9569 = vmatmul.mubr.f32.vlgmr.msra.gmra.mrb[14].mxu1 %v8068_v12 }
 0x341   :  { %9970 = vmatpush3.bf16.msra.mxu1 %v9967_v43  ;;  %9575 = vmatprep.mubr.f32.mxu1 %v8059_v42 }
 0x342   :  { %9972 = vmatprep.subr.bf16.mxu1 %v11261_v34 }
 0x345   :  { %9534 = vmatmul.mubr.f32.vlgmr.msra.gmra.mrb[14].mxu0 %v7561_v56 }
 0x346   :  { %9540 = vmatprep.mubr.f32.mxu0 %v7552_v1  ;;  %9950 = vmatpush3.bf16.msra.mxu0 %v11252_v35 }
 0x347   :  { %9952 = vmatprep.subr.bf16.mxu0 %v9951_v5 }
 0x348   :  { %9576 = vmatmul.mubr.f32.vlgmr.msra.gmra.mrb[14].mxu1 %v8069_v51 }
 0x349   :  { %9974 = vmatpush3.bf16.msra.mxu1 %v11261_v34  ;;  %9582 = vmatprep.mubr.f32.mxu1 %v8060_v50 }
 0x34a   :  { %9976 = vmatprep.subr.bf16.mxu1 %v9975_v7 }
 0x34d   :  { %9541 = vmatmul.mubr.f32.vlgmr.msra.gmra.mrb[14].mxu0 %v7562_v60 }
 0x34e   :  { %9547 = vmatprep.mubr.f32.mxu0 %v11283_v22  ;;  %9954 = vmatpush3.bf16.msra.mxu0 %v9951_v5 }
 0x34f   :  { %9956 = vmatprep.subr.bf16.mxu0 %v11252_v35 }
 0x350   :  { %9583 = vmatmul.mubr.f32.vlgmr.msra.gmra.mrb[14].mxu1 %v8070_v16 }
 0x351   :  { %9978 = vmatpush3.bf16.msra.mxu1 %v9975_v7  ;;  %9589 = vmatprep.mubr.f32.mxu1 %v8058_v26 }
 0x352   :  { %9980 = vmatprep.subr.bf16.mxu1 %v11261_v34 }
 0x355   :  { %9548 = vmatmul.mubr.f32.vlgmr.msra.gmra.mrb[14].mxu0 %v7560_v4 }
 0x356   :  { %9554 = vmatprep.mubr.f32.mxu0 %v11283_v22  ;;  %9958 = vmatpush3.bf16.msra.mxu0 %v11252_v35 }
 0x358   :  { %9590 = vmatmul.mubr.f32.vlgmr.msra.gmra.mrb[14].mxu1 %v8068_v12 }
 0x359   :  { %9982 = vmatpush3.bf16.msra.mxu1 %v11261_v34  ;;  %9596 = vmatprep.mubr.f32.mxu1 %v8058_v26 }
 0x35d   :  { %9555 = vmatmul.mubr.f32.vlgmr.msra.gmra.mrb[14].mxu0 %v7560_v4 }
 0x360   :  { %9597 = vmatmul.mubr.f32.vlgmr.msra.gmra.mrb[14].mxu1 %v8068_v12 }
 0x38a   :  { %v9304_v13 = vpop.f32.mrb[8].mxu0 }
 0x38b   :  { %8494 = vst.msk [vmem:[#allocation8 + $0x8] sm:$0xff] %vm107_vm0, %v9304_v13  ;;  %v4927_v21 = vpop.f32.mrb[9].mxu0 }
 0x38c   :  { %8493 = vst.msk [vmem:[#allocation8] sm:$0xff] %vm107_vm0, %v4927_v21 }
 0x38d   :  { %v9346_v45 = vpop.f32.mrb[8].mxu1 }
 0x38e   :  { %8496 = vst.msk [vmem:[#allocation8 + $0x18] sm:$0xff] %vm107_vm0, %v9346_v45  ;;  %v5435_v40 = vpop.f32.mrb[9].mxu1 }
 0x38f   :  { %8495 = vst.msk [vmem:[#allocation8 + $0x10] sm:$0xff] %vm107_vm0, %v5435_v40 }
 0x390   :  { %10291 = shalt.err (!%p10288_p0)
}
 0x391   :  { %s10292_s5 = scalar_lea.hbm %s11368_s4, 2048 }
 0x392   :  { %p10293_p1 = scmp.ne.s32.totalorder %s11368_s4, %s10292_s5  ;;  %p10296_p2 = scmp.lt.u32.totalorder %s10292_s5, %s11368_s4 }
 0x394   :  { %p10298_p3 = pnand %p10296_p2, %p10293_p1 }
 0x396   :  { %10301 = shalt.err (!%p10298_p3)
}
 0x397   :  { %8532 = dma.vmem_to_hbm [thread:$0]  %s8527_s25, 2048, %s11368_s4, [#allocation10], %s10334_s27, %s10334_s27, %s10335_s28  }
 0x398   :  { %s10338_s4 = smov [#allocation8]  }
 0x399   :  { %s8514_s12 = sshll.u32 %s10338_s4, 4  ;;  %s8515_s12 = int_to_ptr.vmem [resolvable:$true] %s8514_s12 }
 0x39a   :  { %s10302_s1 = scalar_lea.vmem %s8515_s12, 2048  ;;  %p10307_p5 = scmp.lt.s32.totalorder %s8515_s12, %s8515_s12 }
 0x39b   :  { %p10303_p4 = scmp.ne.s32.totalorder %s8515_s12, %s10302_s1  ;;  %p10308_p6 = scmp.lt.s32.totalorder %s10302_s1, %s10302_s1 }
 0x39d   :  { %p10309_p7 = por %p10308_p6, %p10307_p5 }
 0x39f   :  { %p10310_p8 = pnand %p10309_p7, %p10303_p4 }
 0x3b9   :  { %v9388_v6 = vpop.f32.mrb[10].mxu0 }
 0x3ba   :  { %8498 = vst.msk [vmem:[#allocation8 + $0x28] sm:$0xff] %vm107_vm0, %v9388_v6  ;;  %v5943_v59 = vpop.f32.mrb[11].mxu0 }
 0x3bb   :  { %8497 = vst.msk [vmem:[#allocation8 + $0x20] sm:$0xff] %vm107_vm0, %v5943_v59 }
 0x3bc   :  { %v9430_v0 = vpop.f32.mrb[10].mxu1 }
 0x3bd   :  { %8500 = vst.msk [vmem:[#allocation8 + $0x38] sm:$0xff] %vm107_vm0, %v9430_v0  ;;  %v6451_v10 = vpop.f32.mrb[11].mxu1 }
 0x3be   :  { %8499 = vst.msk [vmem:[#allocation8 + $0x30] sm:$0xff] %vm107_vm0, %v6451_v10 }
 0x3ec   :  { %v9472_v11 = vpop.f32.mrb[12].mxu0 }
 0x3ed   :  { %8502 = vst.msk [vmem:[#allocation8 + $0x48] sm:$0xff] %vm107_vm0, %v9472_v11  ;;  %v6959_v14 = vpop.f32.mrb[13].mxu0 }
 0x3ee   :  { %8501 = vst.msk [vmem:[#allocation8 + $0x40] sm:$0xff] %vm107_vm0, %v6959_v14 }
 0x3ef   :  { %v9514_v18 = vpop.f32.mrb[12].mxu1 }
 0x3f0   :  { %8504 = vst.msk [vmem:[#allocation8 + $0x58] sm:$0xff] %vm107_vm0, %v9514_v18  ;;  %v7467_v25 = vpop.f32.mrb[13].mxu1 }
 0x3f1   :  { %8503 = vst.msk [vmem:[#allocation8 + $0x50] sm:$0xff] %vm107_vm0, %v7467_v25 }
 0x430   :  { %v9556_v35 = vpop.f32.mrb[14].mxu0 }
 0x431   :  { %8506 = vst.msk [vmem:[#allocation8 + $0x68] sm:$0xff] %vm107_vm0, %v9556_v35  ;;  %v7975_v29 = vpop.f32.mrb[15].mxu0 }
 0x432   :  { %8505 = vst.msk [vmem:[#allocation8 + $0x60] sm:$0xff] %vm107_vm0, %v7975_v29 }
 0x433   :  { %v9598_v33 = vpop.f32.mrb[14].mxu1 }
 0x434   :  { %8508 = vst.msk [vmem:[#allocation8 + $0x78] sm:$0xff] %vm107_vm0, %v9598_v33  ;;  %v8483_v34 = vpop.f32.mrb[15].mxu1 }
 0x435   :  { %8507 = vst.msk [vmem:[#allocation8 + $0x70] sm:$0xff] %vm107_vm0, %v8483_v34 }
 0x436   :  { %10313 = shalt.err (!%p10310_p8)
}
 0x437   :  { %s10314_s15 = scalar_lea.hbm %s11367_s3, 2048 }
 0x438   :  { %p10315_p9 = scmp.ne.s32.totalorder %s11367_s3, %s10314_s15  ;;  %p10318_p10 = scmp.lt.u32.totalorder %s10314_s15, %s11367_s3 }
 0x43a   :  { %p10320_p11 = pnand %p10318_p10, %p10315_p9 }
 0x43c   :  { %10323 = shalt.err (!%p10320_p11)
}
 0x43d   :  { %8520 = dma.vmem_to_hbm [thread:$0]  %s8515_s12, 2048, %s11367_s3, [#allocation4], %s10334_s27, %s10334_s27, %s10335_s28  }
 0x43e   :  { %10328 = dma.done.wait [#allocation4], 2048  }
 0x43f   :  { %10329 = vsyncadd [#allocation4], 4294965248 }
 0x440   :  { %10330 = dma.done.wait [#allocation10], 2048  }
 0x441   :  { %10331 = vsyncadd [#allocation10], 4294965248 }
 0x442   :  { %8539 = vsyncpa [#allocation3], 1 }
 0x443   :  { %8540 = vsyncpa [#allocation6], 1 }
 0x444   :  { %8541 = vsyncpa [#allocation4], 1 }
 0x445   :  { %8542 = vsyncpa [#allocation10], 1 }

</bundles_post_ra>
